<compile_context>
chip_gen: v7x
topology: tpu7x:2x2x1
jax: 0.10.0
libtpu: 0.0.40
codegen_flags: <defaults>
</compile_context>

<pallas_src>
import jax
import jax.numpy as jnp
from jax.experimental import pallas as pl
from jax.experimental.pallas import tpu as pltpu


# ----------------------------------------------------------------------------
# Fused kernel:
#   per row tile i:  acc  = sum_k A[i,k] @ Xm[k]          (bf16 in, f32 accum)
#   epilogue:        h1   = ReLU(acc @ W1 + b1)           (tm, H) f32
#                    out[i] = PA[:, i-tile] @ h1          (G, H)  f32 partial
# ----------------------------------------------------------------------------
def fused_gcn_pool_kernel(a_ref, xm_ref, w1_ref, b1_ref, pa_ref, out_ref, acc_ref):
    k = pl.program_id(1)

    @pl.when(k == 0)
    def _init():
        acc_ref[...] = jnp.zeros_like(acc_ref)

    # A and Xm are bf16 at the MXU input, f32 accumulation in VMEM scratch
    acc_ref[...] += jnp.dot(a_ref[...], xm_ref[...],
                            preferred_element_type=jnp.float32)

    @pl.when(k == pl.num_programs(1) - 1)
    def _finalize():
        h1 = jnp.dot(acc_ref[...].astype(jnp.bfloat16), w1_ref[...],
                     preferred_element_type=jnp.float32) + b1_ref[...]   # (tm, H)
        h1 = jnp.maximum(h1, 0.0)
        # pooled contribution of this row tile (f32 dot: tiny G x tm x H)
        out_ref[0] = jnp.dot(pa_ref[...], h1,
                             preferred_element_type=jnp.float32)         # (G, H)


# ----------------------------------------------------------------------------
# Tile selection (per perf review):
#   v5e/v6e: biggest tiles (512) -> grid collapses toward (1,1), best roofline
#   v7x    : keep >= 2 row tiles so the "parallel" axis spans both TensorCores
# ----------------------------------------------------------------------------
def _pick_tiles(n_nodes):
    kind = ""
    try:
        kind = jax.devices()[0].device_kind.lower()
    except Exception:
        pass
    tk = min(n_nodes, 512)
    if "v7" in kind and n_nodes >= 512:
        tm = n_nodes // 2
    else:
        tm = min(n_nodes, 512)
    return tm, tk


# ----------------------------------------------------------------------------
# Wrapper
# ----------------------------------------------------------------------------
def gnn_graphpred_forward(adj, features, label_masks, pool_mat,
                          w1, b1, w2, b2, wh, bh, *, tm=None, tk=None):
    N, F = features.shape
    H = w1.shape[1]
    G = pool_mat.shape[0]
    if tm is None or tk is None:
        tm_d, tk_d = _pick_tiles(N)
        tm = tm_d if tm is None else tm
        tk = tk_d if tk is None else tk
    assert N % tm == 0 and N % tk == 0, (N, tm, tk)
    nr, nk = N // tm, N // tk

    # Host/XLA-side prep (bandwidth levers from the perf review):
    adj_bf = adj.astype(jnp.bfloat16)                       # bf16 adjacency stream
    xm_bf = (features * label_masks).astype(jnp.bfloat16)   # pre-masked, pre-cast X
    w1_bf = w1.astype(jnp.bfloat16)                         # weights pre-cast
    pa = jnp.dot(pool_mat, adj, preferred_element_type=jnp.float32)   # (G, N)

    partials = pl.pallas_call(
        fused_gcn_pool_kernel,
        out_shape=jax.ShapeDtypeStruct((nr, G, H), jnp.float32),
        grid_spec=pltpu.PrefetchScalarGridSpec(
            num_scalar_prefetch=0,
            grid=(nr, nk),
            in_specs=[
                pl.BlockSpec((tm, tk), lambda i, k: (i, k)),   # A tile (bf16)
                pl.BlockSpec((tk, F), lambda i, k: (k, 0)),    # masked bf16 features
                pl.BlockSpec((F, H), lambda i, k: (0, 0)),     # W1 (bf16)
                pl.BlockSpec((1, H), lambda i, k: (0, 0)),     # b1 (f32)
                pl.BlockSpec((G, tm), lambda i, k: (0, i)),    # PA columns for row tile
            ],
            # lane-dense (G, H=128) per-row-tile partials -> row axis stays parallel
            out_specs=pl.BlockSpec((1, G, H), lambda i, k: (i, 0, 0)),
            scratch_shapes=[pltpu.VMEM((tm, F), jnp.float32)],
        ),
        compiler_params=pltpu.CompilerParams(
            dimension_semantics=("parallel", "arbitrary")),
    )(adj_bf, xm_bf, w1_bf, b1, pa)

    # Tiny f32 tail on (G, H): second GCN transform + pooled bias + prediction head.
    pooled_h1 = partials.sum(axis=0)                         # (G, H)
    row_sums = pool_mat.sum(axis=1, keepdims=True)           # (G, 1); 1 for non-empty graphs
    pooled_h2 = jnp.dot(pooled_h1, w2) + row_sums * b2       # (G, C_in)  pooled node repr
    return jnp.dot(pooled_h2, wh) + bh                       # (G, O)     graph_pred_linear


# ----------------------------------------------------------------------------
# Host-side glue (graph densification / pooling-matrix construction)
# ----------------------------------------------------------------------------
def build_normalized_adjacency(edges, n_nodes):
    """edges: (2, E) int32 -> symmetric-normalized dense adjacency with self-loops."""
    a = jnp.zeros((n_nodes, n_nodes), jnp.float32)
    a = a.at[edges[0], edges[1]].set(1.0)
    a = a.at[edges[1], edges[0]].set(1.0)
    idx = jnp.arange(n_nodes)
    a = a.at[idx, idx].set(1.0)
    deg = a.sum(axis=1)
    d = jax.lax.rsqrt(deg)
    return a * d[:, None] * d[None, :]


def build_mean_pool_matrix(batch, n_graphs):
    """batch: (N,) graph id per node -> (G, N) row-normalized one-hot (global_mean_pool)."""
    onehot = (batch[None, :] == jnp.arange(n_graphs)[:, None]).astype(jnp.float32)
    counts = jnp.maximum(onehot.sum(axis=1, keepdims=True), 1.0)
    return onehot / counts


if __name__ == "__main__":
    key = jax.random.PRNGKey(0)

    # --- sizes: G=8 graphs of 64 nodes packed into one 512-node batch; head dims
    #     fixed by the module (input_channels=8, output_channels=1). ---
    N = 512
    G = 8
    NODES_PER_GRAPH = N // G
    E = 2048
    F_IN = 128          # raw node feature dim
    HIDDEN = 128        # gnn hidden dim
    C_IN = 8            # gnn output dim == head input_channels
    O_OUT = 1           # head output_channels

    k_e, k_x, k_m, k_w1, k_b1, k_w2, k_b2, k_wh, k_bh = jax.random.split(key, 9)

    # --- synthetic graph data (nodes sorted by graph id) ---
    edges = jax.random.randint(k_e, (2, E), 0, N, dtype=jnp.int32)
    features = jax.random.normal(k_x, (N, F_IN), jnp.float32)
    label_masks = (jax.random.uniform(k_m, (N, 1)) > 0.2).astype(jnp.float32)
    batch = jnp.repeat(jnp.arange(G, dtype=jnp.int32), NODES_PER_GRAPH)

    adj_norm = build_normalized_adjacency(edges, N)                 # (N, N) f32
    pool_mat = build_mean_pool_matrix(batch, G)                     # (G, N)

    # --- deterministic parameters (synthetic; no checkpoint load) ---
    w1 = jax.random.normal(k_w1, (F_IN, HIDDEN), jnp.float32) * 0.1
    b1 = jax.random.normal(k_b1, (1, HIDDEN), jnp.float32) * 0.01
    w2 = jax.random.normal(k_w2, (HIDDEN, C_IN), jnp.float32) * 0.1
    b2 = jax.random.normal(k_b2, (1, C_IN), jnp.float32) * 0.01
    wh = jax.random.normal(k_wh, (C_IN, O_OUT), jnp.float32) * 0.1
    bh = jax.random.normal(k_bh, (1, O_OUT), jnp.float32) * 0.01
    # TODO(synk): the unused last gnn layer (`self.unuse_layer`) is intentionally not materialized.
    # TODO(synk): dropout in the gnn stack is eval-mode identity and is not modeled.

    out = gnn_graphpred_forward(adj_norm, features, label_masks, pool_mat,
                                w1, b1, w2, b2, wh, bh)
    out = jax.block_until_ready(out)

    # --- pure-JAX reference mirroring the kernel's math (bf16 MXU inputs for the
    #     two large matmuls, f32 accumulation, pool@A reassociation) ---
    xm_bf = (features * label_masks).astype(jnp.bfloat16)
    acc1 = jnp.dot(adj_norm.astype(jnp.bfloat16), xm_bf,
                   preferred_element_type=jnp.float32)
    h1 = jnp.maximum(
        jnp.dot(acc1.astype(jnp.bfloat16), w1.astype(jnp.bfloat16),
                preferred_element_type=jnp.float32) + b1, 0.0)
    pa = jnp.dot(pool_mat, adj_norm, preferred_element_type=jnp.float32)
    pooled_h1 = jnp.dot(pa, h1, preferred_element_type=jnp.float32)
    row_sums = pool_mat.sum(axis=1, keepdims=True)
    pooled_h2 = jnp.dot(pooled_h1, w2) + row_sums * b2
    ref = jnp.dot(pooled_h2, wh) + bh

    assert out.shape == (G, O_OUT), out.shape
    assert jnp.allclose(out, ref, atol=2e-3, rtol=2e-3), (out, ref)

    print("KERNEL_OK")
</pallas_src>

<mosaic_0001>
module attributes {stable_mosaic.version = 11 : i64} {
  func.func @fused_gcn_pool_kernel(%arg0: i32, %arg1: i32, %arg2: memref<512x512xbf16, #tpu.memory_space<vmem>>, %arg3: memref<512x128xbf16, #tpu.memory_space<vmem>>, %arg4: memref<128x128xbf16, #tpu.memory_space<vmem>>, %arg5: memref<1x128xf32, #tpu.memory_space<vmem>>, %arg6: memref<8x512xf32, #tpu.memory_space<vmem>>, %arg7: memref<1x8x128xf32, #tpu.memory_space<vmem>>, %arg8: memref<512x128xf32, #tpu.memory_space<vmem>>) attributes {dimension_semantics = [#tpu.dimension_semantics<parallel>, #tpu.dimension_semantics<arbitrary>], iteration_bounds = array<i64: 1, 1>, scalar_prefetch = 0 : i64, scratch_operands = 1 : i64, tpu.core_type = #tpu.core_type<tc>, window_params = [{transform_indices = @transform_0, window_bounds = array<i64: 512, 512>}, {transform_indices = @transform_1, window_bounds = array<i64: 512, 128>}, {pipeline_mode = #tpu.pipeline_mode<synchronous>, transform_indices = @transform_2, window_bounds = array<i64: 128, 128>}, {pipeline_mode = #tpu.pipeline_mode<synchronous>, transform_indices = @transform_3, window_bounds = array<i64: 1, 128>}, {transform_indices = @transform_4, window_bounds = array<i64: 8, 512>}, {transform_indices = @transform_5, window_bounds = array<i64: 1, 8, 128>}]} {
    %c0_i32 = arith.constant 0 : i32
    %0 = arith.cmpi eq, %arg1, %c0_i32 : i32
    %1 = arith.extui %0 : i1 to i32
    %c0_i32_0 = arith.constant 0 : i32
    %2 = arith.cmpi ne, %1, %c0_i32_0 : i32
    scf.if %2 {
      %cst_10 = arith.constant 0.000000e+00 : f32
      %12 = vector.broadcast %cst_10 : f32 to vector<512x128xf32>
      %c0_11 = arith.constant 0 : index
      %c0_12 = arith.constant 0 : index
      %13 = vector.load %arg8[%c0_11, %c0_12] : memref<512x128xf32, #tpu.memory_space<vmem>>, vector<512x128xf32>
      tpu.vector_store %arg8[%c0_11, %c0_12], %12 {strides = array<i32>} : memref<512x128xf32, #tpu.memory_space<vmem>>, vector<512x128xf32>,
    } else {
    }
    %c0 = arith.constant 0 : index
    %c0_1 = arith.constant 0 : index
    %3 = vector.load %arg8[%c0, %c0_1] : memref<512x128xf32, #tpu.memory_space<vmem>>, vector<512x128xf32>
    %c0_2 = arith.constant 0 : index
    %c0_3 = arith.constant 0 : index
    %4 = vector.load %arg2[%c0_2, %c0_3] : memref<512x512xbf16, #tpu.memory_space<vmem>>, vector<512x512xbf16>
    %c0_4 = arith.constant 0 : index
    %c0_5 = arith.constant 0 : index
    %5 = vector.load %arg3[%c0_4, %c0_5] : memref<512x128xbf16, #tpu.memory_space<vmem>>, vector<512x128xbf16>
    %cst = arith.constant dense<0.000000e+00> : vector<512x128xf32>
    %6 = tpu.matmul %4, %5, %cst {dimension_numbers = #tpu.dot_dimension_numbers<[1], [0], [0], [1], [0, 0, 1, 1], [], []>} : vector<512x512xbf16>, vector<512x128xbf16>, vector<512x128xf32> -> vector<512x128xf32>
    %7 = arith.addf %3, %6 : vector<512x128xf32>
    %c0_6 = arith.constant 0 : index
    %c0_7 = arith.constant 0 : index
    %8 = vector.load %arg8[%c0_6, %c0_7] : memref<512x128xf32, #tpu.memory_space<vmem>>, vector<512x128xf32>
    tpu.vector_store %arg8[%c0_6, %c0_7], %7 {strides = array<i32>} : memref<512x128xf32, #tpu.memory_space<vmem>>, vector<512x128xf32>,
    %c0_i32_8 = arith.constant 0 : i32
    %9 = arith.cmpi eq, %arg1, %c0_i32_8 : i32
    %10 = arith.extui %9 : i1 to i32
    %c0_i32_9 = arith.constant 0 : i32
    %11 = arith.cmpi ne, %10, %c0_i32_9 : i32
    scf.if %11 {
      %c0_10 = arith.constant 0 : index
      %c0_11 = arith.constant 0 : index
      %12 = vector.load %arg8[%c0_10, %c0_11] : memref<512x128xf32, #tpu.memory_space<vmem>>, vector<512x128xf32>
      %13 = arith.truncf %12 : vector<512x128xf32> to vector<512x128xbf16>
      %c0_12 = arith.constant 0 : index
      %c0_13 = arith.constant 0 : index
      %14 = vector.load %arg4[%c0_12, %c0_13] : memref<128x128xbf16, #tpu.memory_space<vmem>>, vector<128x128xbf16>
      %cst_14 = arith.constant dense<0.000000e+00> : vector<512x128xf32>
      %15 = tpu.matmul %13, %14, %cst_14 {dimension_numbers = #tpu.dot_dimension_numbers<[1], [0], [0], [1], [0, 0, 1, 1], [], []>} : vector<512x128xbf16>, vector<128x128xbf16>, vector<512x128xf32> -> vector<512x128xf32>
      %c0_15 = arith.constant 0 : index
      %c0_16 = arith.constant 0 : index
      %16 = vector.load %arg5[%c0_15, %c0_16] : memref<1x128xf32, #tpu.memory_space<vmem>>, vector<1x128xf32>
      %17 = vector.broadcast %16 : vector<1x128xf32> to vector<512x128xf32>
      %18 = arith.addf %15, %17 : vector<512x128xf32>
      %cst_17 = arith.constant 0.000000e+00 : f32
      %19 = vector.broadcast %cst_17 : f32 to vector<512x128xf32>
      %20 = arith.maximumf %18, %19 : vector<512x128xf32>
      %c0_18 = arith.constant 0 : index
      %c0_19 = arith.constant 0 : index
      %21 = vector.load %arg6[%c0_18, %c0_19] : memref<8x512xf32, #tpu.memory_space<vmem>>, vector<8x512xf32>
      %cst_20 = arith.constant dense<0.000000e+00> : vector<8x128xf32>
      %22 = tpu.matmul %21, %20, %cst_20 {dimension_numbers = #tpu.dot_dimension_numbers<[1], [0], [0], [1], [0, 0, 1, 1], [], []>} : vector<8x512xf32>, vector<512x128xf32>, vector<8x128xf32> -> vector<8x128xf32>
      %c0_21 = arith.constant 0 : index
      %c0_22 = arith.constant 0 : index
      %c0_23 = arith.constant 0 : index
      %23 = vector.load %arg7[%c0_21, %c0_22, %c0_23] : memref<1x8x128xf32, #tpu.memory_space<vmem>>, vector<1x8x128xf32>
      %24 = vector.shape_cast %23 : vector<1x8x128xf32> to vector<8x128xf32>
      %25 = vector.shape_cast %22 : vector<8x128xf32> to vector<1x8x128xf32>
      tpu.vector_store %arg7[%c0_21, %c0_22, %c0_23], %25 {strides = array<i32>} : memref<1x8x128xf32, #tpu.memory_space<vmem>>, vector<1x8x128xf32>,
    } else {
    }
    return
  }
  func.func @transform_0(%arg0: i32, %arg1: i32) -> (i32, i32) {
    %c0_i32 = arith.constant 0 : i32
    return %arg0, %arg1 : i32, i32
  }
  func.func @transform_1(%arg0: i32, %arg1: i32) -> (i32, i32) {
    %c0_i32 = arith.constant 0 : i32
    %c0_i32_0 = arith.constant 0 : i32
    return %arg1, %c0_i32 : i32, i32
  }
  func.func @transform_2(%arg0: i32, %arg1: i32) -> (i32, i32) {
    %c0_i32 = arith.constant 0 : i32
    %c0_i32_0 = arith.constant 0 : i32
    %c0_i32_1 = arith.constant 0 : i32
    return %c0_i32, %c0_i32_0 : i32, i32
  }
  func.func @transform_3(%arg0: i32, %arg1: i32) -> (i32, i32) {
    %c0_i32 = arith.constant 0 : i32
    %c0_i32_0 = arith.constant 0 : i32
    %c0_i32_1 = arith.constant 0 : i32
    return %c0_i32, %c0_i32_0 : i32, i32
  }
  func.func @transform_4(%arg0: i32, %arg1: i32) -> (i32, i32) {
    %c0_i32 = arith.constant 0 : i32
    %c0_i32_0 = arith.constant 0 : i32
    return %c0_i32, %arg0 : i32, i32
  }
  func.func @transform_5(%arg0: i32, %arg1: i32) -> (i32, i32, i32) {
    %c0_i32 = arith.constant 0 : i32
    %c0_i32_0 = arith.constant 0 : i32
    %c0_i32_1 = arith.constant 0 : i32
    return %arg0, %c0_i32, %c0_i32_0 : i32, i32, i32
  }
}

</mosaic_0001>

<bundles_post_ra>
// kernel: tpu_custom_call.1
= control target key start
LH: loop header
LB: loop body
LE: loop exit
PB: predicated region body
PF: predicated region fallthrough
CT: control target
= control target key end

     0   :  { %10 = vsyncpa [#allocation4], 0  ;;  %s3911_s0 = inlined_call_operand.hbm [shape: bf16[512,512], index: 0, kind: input, shape index: {}]   ;;  %s3912_s1 = inlined_call_operand.hbm [shape: bf16[512,128], index: 1, kind: input, shape index: {}]   ;;  %s3913_s2 = inlined_call_operand.hbm [shape: bf16[128,128], index: 2, kind: input, shape index: {}]   ;;  %s3914_s3 = inlined_call_operand.vmem [shape: f32[1,128], index: 3, kind: input, shape index: {}]   ;;  %s3915_s4 = inlined_call_operand.hbm [shape: f32[8,512], index: 4, kind: input, shape index: {}]   ;;  %s3916_s5 = inlined_call_operand.hbm [shape: f32[1,8,128], index: 5, kind: output, shape index: {}]  }
   0x1   :  { %11 = vsyncpa [#allocation7], 0 }
   0x2   :  { %12 = vsyncpa [#allocation10], 0 }
   0x3   :  { %13 = vsyncpa [#allocation5], 0  ;;  %s3523_s18 = smov [#allocation6]   ;;  %s3405_s22 = scalar_lea.hbm %s3912_s1, 4096 }
   0x4   :  { %s31_s19 = sshll.u32 %s3523_s18, 4  ;;  %p3406_p0 = scmp.ne.s32.totalorder %s3912_s1, %s3405_s22  ;;  %s32_s19 = int_to_ptr.vmem [resolvable:$true] %s31_s19 }
   0x5   :  { %p3409_p1 = scmp.lt.u32.totalorder %s3405_s22, %s3912_s1 }
   0x7   :  { %p3411_p2 = pnand %p3409_p1, %p3406_p0 }
   0x9   :  { %3414 = shalt.err (!%p3411_p2)
}
   0xa   :  { %s3415_s27 = scalar_lea.vmem %s32_s19, 4096  ;;  %p3420_p4 = scmp.lt.s32.totalorder %s32_s19, %s32_s19 }
   0xb   :  { %p3416_p3 = scmp.ne.s32.totalorder %s32_s19, %s3415_s27  ;;  %p3421_p5 = scmp.lt.s32.totalorder %s3415_s27, %s3415_s27 }
   0xd   :  { %p3422_p6 = por %p3421_p5, %p3420_p4 }
   0xf   :  { %p3423_p7 = pnand %p3422_p6, %p3416_p3 }
  0x11   :  { %3426 = shalt.err (!%p3423_p7)
}
  0x12   :  { %s3524_s28 = smov 64   ;;  %s3525_s29 = smov 4  }
  0x13   :  { %37 = dma.hbm_to_vmem [thread:$0]  %s3912_s1, 4096, %s32_s19, [#allocation7], %s3524_s28, %s3524_s28, %s3525_s29  }
  0x14   :  { %s3526_s7 = smov [#allocation3]   ;;  %s3427_s11 = scalar_lea.hbm %s3911_s0, 16384 }
  0x15   :  { %s19_s8 = sshll.u32 %s3526_s7, 4  ;;  %p3428_p8 = scmp.ne.s32.totalorder %s3911_s0, %s3427_s11  ;;  %s20_s8 = int_to_ptr.vmem [resolvable:$true] %s19_s8 }
  0x16   :  { %p3431_p9 = scmp.lt.u32.totalorder %s3427_s11, %s3911_s0 }
  0x18   :  { %p3433_p10 = pnand %p3431_p9, %p3428_p8 }
  0x1a   :  { %3436 = shalt.err (!%p3433_p10)
}
  0x1b   :  { %s3437_s16 = scalar_lea.vmem %s20_s8, 16384  ;;  %p3442_p12 = scmp.lt.s32.totalorder %s20_s8, %s20_s8 }
  0x1c   :  { %p3438_p11 = scmp.ne.s32.totalorder %s20_s8, %s3437_s16  ;;  %p3443_p13 = scmp.lt.s32.totalorder %s3437_s16, %s3437_s16 }
  0x1e   :  { %p3444_p0 = por %p3443_p13, %p3442_p12 }
  0x20   :  { %p3445_p1 = pnand %p3444_p0, %p3438_p11 }
  0x22   :  { %3448 = shalt.err (!%p3445_p1)
}
  0x23   :  { %s3527_s1 = smov 256   ;;  %s3528_s17 = smov 16  }
  0x24   :  { %25 = dma.hbm_to_vmem [thread:$0]  %s3911_s0, 16384, %s20_s8, [#allocation4], %s3527_s1, %s3527_s1, %s3528_s17  }
  0x25   :  { %s3529_s20 = smov [#allocation8]   ;;  %s3530_s22 = smov [#allocation9]  }
  0x26   :  { %s43_s21 = sshll.u32 %s3529_s20, 4  ;;  %s58_s23 = sshll.u32 %s3530_s22, 4  ;;  %s44_s21 = int_to_ptr.vmem [resolvable:$true] %s43_s21  ;;  %s59_s23 = int_to_ptr.vmem [resolvable:$true] %s58_s23 }
  0x27   :  { %s3449_s26 = scalar_lea.hbm %s3913_s2, 1024 }
  0x28   :  { %p3450_p2 = scmp.ne.s32.totalorder %s3913_s2, %s3449_s26  ;;  %p3453_p3 = scmp.lt.u32.totalorder %s3449_s26, %s3913_s2 }
  0x2a   :  { %p3455_p4 = pnand %p3453_p3, %p3450_p2 }
  0x2c   :  { %3458 = shalt.err (!%p3455_p4)
}
  0x2d   :  { %s3459_s0 = scalar_lea.vmem %s44_s21, 1024  ;;  %p3464_p6 = scmp.lt.s32.totalorder %s44_s21, %s44_s21 }
  0x2e   :  { %p3460_p5 = scmp.ne.s32.totalorder %s44_s21, %s3459_s0  ;;  %p3465_p7 = scmp.lt.s32.totalorder %s3459_s0, %s3459_s0 }
  0x30   :  { %p3466_p8 = por %p3465_p7, %p3464_p6 }
  0x32   :  { %p3467_p9 = pnand %p3466_p8, %p3460_p5 }
  0x34   :  { %3470 = shalt.err (!%p3467_p9)
}
  0x35   :  { %49 = dma.hbm_to_vmem [thread:$0]  %s3913_s2, 1024, %s44_s21, [#allocation7], %s3524_s28, %s3524_s28, %s3525_s29  }
  0x36   :  { %s3471_s12 = scalar_lea.hbm %s3915_s4, 512 }
  0x37   :  { %p3472_p10 = scmp.ne.s32.totalorder %s3915_s4, %s3471_s12  ;;  %p3475_p11 = scmp.lt.u32.totalorder %s3471_s12, %s3915_s4 }
  0x39   :  { %p3477_p12 = pnand %p3475_p11, %p3472_p10 }
  0x3b   :  { %3480 = shalt.err (!%p3477_p12)
}
  0x3c   :  { %s3481_s1 = scalar_lea.vmem %s59_s23, 512  ;;  %p3486_p0 = scmp.lt.s32.totalorder %s59_s23, %s59_s23 }
  0x3d   :  { %p3482_p13 = scmp.ne.s32.totalorder %s59_s23, %s3481_s1  ;;  %p3487_p1 = scmp.lt.s32.totalorder %s3481_s1, %s3481_s1 }
  0x3f   :  { %p3488_p2 = por %p3487_p1, %p3486_p0 }
  0x41   :  { %p3489_p3 = pnand %p3488_p2, %p3482_p13 }
  0x43   :  { %3492 = shalt.err (!%p3489_p3)
}
  0x44   :  { %61 = dma.hbm_to_vmem [thread:$0]  %s3915_s4, 512, %s59_s23, [#allocation10]  }
  0x45   :  { %3515 = dma.done.wait [#allocation4], 16384  }
  0x46   :  { %3516 = vsyncadd [#allocation4], 4294950912 }
  0x47   :  { %3517 = dma.done.wait [#allocation7], 5120  }
  0x48   :  { %3518 = vsyncadd [#allocation7], 4294962176 }
  0x49   :  { %3519 = dma.done.wait [#allocation10], 512  }
  0x4a   :  { %3520 = vsyncadd [#allocation10], 4294966784  ;;  %v3531_v0 = vmov 0   ;;  %v3173_v1 = vld [vmem:[#allocation6] sm:$0xff]   ;;  %v3174_v2 = vld [vmem:[#allocation6 + $0x8] sm:$0xff]  }
  0x4b   :  { %1231 = vmatprep.subr.bf16.mxu0 %v3531_v0  ;;  %3045 = vmatprep.subr.bf16.mxu1 %v3531_v0  ;;  %v3175_v3 = vld [vmem:[#allocation6 + $0x10] sm:$0xff]   ;;  %v3176_v4 = vld [vmem:[#allocation6 + $0x18] sm:$0xff]   ;;  %v3177_v5 = vld [vmem:[#allocation6 + $0x20] sm:$0xff]  }
  0x4c   :  { %1232 = vmatpush1.bf16.msra.mxu0 %v3173_v1  ;;  %3061 = vmatpush1.bf16.msra.mxu1 %v3173_v1  ;;  %v3191_v6 = vld [vmem:[#allocation3 + $0x4] ss:$16 sps:$4 sm:$0xff]   ;;  %v3178_v7 = vld [vmem:[#allocation6 + $0x28] sm:$0xff]   ;;  %v3180_v9 = vld [vmem:[#allocation6 + $0x38] sm:$0xff]  }
  0x4d   :  { %1233 = vmatprep.subr.bf16.mxu0 %v3531_v0  ;;  %3046 = vmatprep.subr.bf16.mxu1 %v3531_v0  ;;  %v3179_v8 = vld [vmem:[#allocation6 + $0x30] sm:$0xff]   ;;  %v3181_v10 = vld [vmem:[#allocation6 + $0x40] sm:$0xff]   ;;  %v3182_v11 = vld [vmem:[#allocation6 + $0x48] sm:$0xff]  }
  0x4e   :  { %1263 = vmatprep.mubr.bf16.mxu0 %v3191_v6  ;;  %v3183_v12 = vld [vmem:[#allocation6 + $0x50] sm:$0xff]   ;;  %v3184_v13 = vld [vmem:[#allocation6 + $0x58] sm:$0xff]   ;;  %v3185_v14 = vld [vmem:[#allocation6 + $0x60] sm:$0xff]  }
  0x4f   :  { %v3186_v15 = vld [vmem:[#allocation6 + $0x68] sm:$0xff]   ;;  %v3187_v16 = vld [vmem:[#allocation6 + $0x70] sm:$0xff]   ;;  %v3188_v17 = vld [vmem:[#allocation6 + $0x78] sm:$0xff]  }
  0x50   :  { %1234 = vmatpush1.bf16.msra.mxu0 %v3174_v2  ;;  %3062 = vmatpush1.bf16.msra.mxu1 %v3174_v2  ;;  %v3189_v18 = vld [vmem:[#allocation3] ss:$16 sps:$4 sm:$0xff]   ;;  %v3193_v20 = vld [vmem:[#allocation3 + $0x24] ss:$16 sps:$4 sm:$0xff]   ;;  %v3195_v21 = vld [vmem:[#allocation6 + $0x88] sm:$0xff]  }
  0x51   :  { %1235 = vmatprep.subr.bf16.mxu0 %v3531_v0  ;;  %3047 = vmatprep.subr.bf16.mxu1 %v3531_v0  ;;  %v3192_v19 = vld [vmem:[#allocation6 + $0x80] sm:$0xff]   ;;  %v3197_v23 = vld [vmem:[#allocation6 + $0x90] sm:$0xff]   ;;  %v3201_v27 = vld [vmem:[#allocation6 + $0x98] sm:$0xff]  }
  0x52   :  { %v3196_v22 = vld [vmem:[#allocation3 + $0x20] ss:$16 sps:$4 sm:$0xff]   ;;  %v3198_v24 = vld [vmem:[#allocation3 + $0x44] ss:$16 sps:$4 sm:$0xff]   ;;  %v3206_v33 = vld [vmem:[#allocation6 + $0xa8] sm:$0xff]  }
  0x53   :  { %v3259_v25 = vld [vmem:[#allocation3 + $0x160] ss:$16 sps:$4 sm:$0xff]   ;;  %v3261_v26 = vld [vmem:[#allocation3 + $0x164] ss:$16 sps:$4 sm:$0xff]   ;;  %v3214_v39 = vld [vmem:[#allocation6 + $0xb8] sm:$0xff]  }
  0x54   :  { %1236 = vmatpush1.bf16.msra.mxu0 %v3175_v3  ;;  %3063 = vmatpush1.bf16.msra.mxu1 %v3175_v3  ;;  %v3200_v28 = vld [vmem:[#allocation3 + $0x40] ss:$16 sps:$4 sm:$0xff]   ;;  %v3202_v29 = vld [vmem:[#allocation3 + $0x64] ss:$16 sps:$4 sm:$0xff]   ;;  %v3219_v45 = vld [vmem:[#allocation6 + $0xc8] sm:$0xff]  }
  0x55   :  { %1237 = vmatprep.subr.bf16.mxu0 %v3531_v0  ;;  %3048 = vmatprep.subr.bf16.mxu1 %v3531_v0  ;;  %v3204_v30 = vld [vmem:[#allocation6 + $0xa0] sm:$0xff]   ;;  %v3210_v36 = vld [vmem:[#allocation6 + $0xb0] sm:$0xff]   ;;  %v3224_v51 = vld [vmem:[#allocation6 + $0xd8] sm:$0xff]  }
  0x56   :  { %1351 = vmatprep.mubr.bf16.mxu1 %v3261_v26  ;;  %v3265_v31 = vld [vmem:[#allocation3 + $0x184] ss:$16 sps:$4 sm:$0xff]   ;;  %v3267_v32 = vld [vmem:[#allocation3 + $0x180] ss:$16 sps:$4 sm:$0xff]   ;;  %v3232_v57 = vld [vmem:[#allocation6 + $0xe8] sm:$0xff]  }
  0x57   :  { %v3205_v34 = vld [vmem:[#allocation3 + $0x60] ss:$16 sps:$4 sm:$0xff]   ;;  %v3207_v35 = vld [vmem:[#allocation3 + $0x84] ss:$16 sps:$4 sm:$0xff]   ;;  %v3237_v63 = vld [vmem:[#allocation6 + $0xf8] sm:$0xff]  }
  0x58   :  { %1238 = vmatpush1.bf16.msra.mxu0 %v3176_v4  ;;  %3064 = vmatpush1.bf16.msra.mxu1 %v3176_v4  ;;  %v3271_v37 = vld [vmem:[#allocation3 + $0x1a4] ss:$16 sps:$4 sm:$0xff]   ;;  %v3273_v38 = vld [vmem:[#allocation3 + $0x1a0] ss:$16 sps:$4 sm:$0xff]  }
  0x59   :  { %1239 = vmatprep.subr.bf16.mxu0 %v3531_v0  ;;  %3049 = vmatprep.subr.bf16.mxu1 %v3531_v0  ;;  %v3209_v40 = vld [vmem:[#allocation3 + $0x80] ss:$16 sps:$4 sm:$0xff]   ;;  %v3211_v41 = vld [vmem:[#allocation3 + $0xa4] ss:$16 sps:$4 sm:$0xff]  }
  0x5a   :  { %v3215_v42 = vld [vmem:[#allocation6 + $0xc0] sm:$0xff]   ;;  %v3223_v48 = vld [vmem:[#allocation6 + $0xd0] sm:$0xff]  }
  0x5b   :  { %v3277_v43 = vld [vmem:[#allocation3 + $0x1c4] ss:$16 sps:$4 sm:$0xff]   ;;  %v3279_v44 = vld [vmem:[#allocation3 + $0x1c0] ss:$16 sps:$4 sm:$0xff]  }
  0x5c   :  { %1240 = vmatpush1.bf16.msra.mxu0 %v3177_v5  ;;  %3065 = vmatpush1.bf16.msra.mxu1 %v3177_v5  ;;  %v3213_v46 = vld [vmem:[#allocation3 + $0xa0] ss:$16 sps:$4 sm:$0xff]   ;;  %v3216_v47 = vld [vmem:[#allocation3 + $0xc4] ss:$16 sps:$4 sm:$0xff]  }
  0x5d   :  { %1241 = vmatprep.subr.bf16.mxu0 %v3531_v0  ;;  %3050 = vmatprep.subr.bf16.mxu1 %v3531_v0  ;;  %v3283_v49 = vld [vmem:[#allocation3 + $0x1e4] ss:$16 sps:$4 sm:$0xff]   ;;  %v3285_v50 = vld [vmem:[#allocation3 + $0x1e0] ss:$16 sps:$4 sm:$0xff]  }
  0x5e   :  { %v3218_v52 = vld [vmem:[#allocation3 + $0xc0] ss:$16 sps:$4 sm:$0xff]   ;;  %v3220_v53 = vld [vmem:[#allocation3 + $0xe4] ss:$16 sps:$4 sm:$0xff]  }
  0x5f   :  { %v3228_v54 = vld [vmem:[#allocation6 + $0xe0] sm:$0xff]   ;;  %v3233_v60 = vld [vmem:[#allocation6 + $0xf0] sm:$0xff]  }
  0x60   :  { %1242 = vmatpush1.bf16.msra.mxu0 %v3178_v7  ;;  %3066 = vmatpush1.bf16.msra.mxu1 %v3178_v7  ;;  %v3289_v55 = vld [vmem:[#allocation3 + $0x204] ss:$16 sps:$4 sm:$0xff]   ;;  %v3291_v56 = vld [vmem:[#allocation3 + $0x200] ss:$16 sps:$4 sm:$0xff]  }
  0x61   :  { %1243 = vmatprep.subr.bf16.mxu0 %v3531_v0  ;;  %3051 = vmatprep.subr.bf16.mxu1 %v3531_v0  ;;  %v3222_v58 = vld [vmem:[#allocation3 + $0xe0] ss:$16 sps:$4 sm:$0xff]   ;;  %v3225_v59 = vld [vmem:[#allocation3 + $0x104] ss:$16 sps:$4 sm:$0xff]  }
  0x62   :  { %v3295_v61 = vld [vmem:[#allocation3 + $0x224] ss:$16 sps:$4 sm:$0xff]   ;;  %v3297_v62 = vld [vmem:[#allocation3 + $0x220] ss:$16 sps:$4 sm:$0xff]  }
  0x63   :  { %v3227_v1 = vld [vmem:[#allocation3 + $0x100] ss:$16 sps:$4 sm:$0xff]   ;;  %v3229_v2 = vld [vmem:[#allocation3 + $0x124] ss:$16 sps:$4 sm:$0xff]  }
  0x64   :  { %1244 = vmatpush1.bf16.msra.mxu0 %v3179_v8  ;;  %3067 = vmatpush1.bf16.msra.mxu1 %v3179_v8  ;;  %v3301_v3 = vld [vmem:[#allocation3 + $0x244] ss:$16 sps:$4 sm:$0xff]   ;;  %v3303_v4 = vld [vmem:[#allocation3 + $0x240] ss:$16 sps:$4 sm:$0xff]  }
  0x65   :  { %1245 = vmatprep.subr.bf16.mxu0 %v3531_v0  ;;  %3052 = vmatprep.subr.bf16.mxu1 %v3531_v0  ;;  %v3231_v5 = vld [vmem:[#allocation3 + $0x120] ss:$16 sps:$4 sm:$0xff]   ;;  %v3234_v6 = vld [vmem:[#allocation3 + $0x144] ss:$16 sps:$4 sm:$0xff]  }
  0x66   :  { %v3307_v7 = vld [vmem:[#allocation3 + $0x264] ss:$16 sps:$4 sm:$0xff]   ;;  %v3309_v8 = vld [vmem:[#allocation3 + $0x260] ss:$16 sps:$4 sm:$0xff]  }
  0x67   :  { %v3337_v26 = vld [vmem:[#allocation3 + $0x304] ss:$16 sps:$4 sm:$0xff]  }
  0x68   :  { %1246 = vmatpush1.bf16.msra.mxu0 %v3180_v9  ;;  %3068 = vmatpush1.bf16.msra.mxu1 %v3180_v9  ;;  %v3240_v9 = vld [vmem:[#allocation3 + $0xc] ss:$16 sps:$4 sm:$0xff]  }
  0x69   :  { %1247 = vmatprep.subr.bf16.mxu0 %v3531_v0  ;;  %3053 = vmatprep.subr.bf16.mxu1 %v3531_v0 }
  0x6c   :  { %1248 = vmatpush1.bf16.msra.mxu0 %v3181_v10  ;;  %3069 = vmatpush1.bf16.msra.mxu1 %v3181_v10  ;;  %v3313_v10 = vld [vmem:[#allocation3 + $0x284] ss:$16 sps:$4 sm:$0xff]  }
  0x6d   :  { %1249 = vmatprep.subr.bf16.mxu0 %v3531_v0  ;;  %3054 = vmatprep.subr.bf16.mxu1 %v3531_v0 }
  0x70   :  { %1250 = vmatpush1.bf16.msra.mxu0 %v3182_v11  ;;  %3070 = vmatpush1.bf16.msra.mxu1 %v3182_v11  ;;  %v3315_v11 = vld [vmem:[#allocation3 + $0x280] ss:$16 sps:$4 sm:$0xff]  }
  0x71   :  { %1251 = vmatprep.subr.bf16.mxu0 %v3531_v0  ;;  %3055 = vmatprep.subr.bf16.mxu1 %v3531_v0 }
  0x74   :  { %1252 = vmatpush1.bf16.msra.mxu0 %v3183_v12  ;;  %3071 = vmatpush1.bf16.msra.mxu1 %v3183_v12  ;;  %v3238_v12 = vld [vmem:[#allocation3 + $0x8] ss:$16 sps:$4 sm:$0xff]  }
  0x75   :  { %1253 = vmatprep.subr.bf16.mxu0 %v3531_v0  ;;  %3056 = vmatprep.subr.bf16.mxu1 %v3531_v0 }
  0x78   :  { %1254 = vmatpush1.bf16.msra.mxu0 %v3184_v13  ;;  %3072 = vmatpush1.bf16.msra.mxu1 %v3184_v13  ;;  %v3241_v13 = vld [vmem:[#allocation3 + $0x2c] ss:$16 sps:$4 sm:$0xff]  }
  0x79   :  { %1255 = vmatprep.subr.bf16.mxu0 %v3531_v0  ;;  %3057 = vmatprep.subr.bf16.mxu1 %v3531_v0 }
  0x7c   :  { %1256 = vmatpush1.bf16.msra.mxu0 %v3185_v14  ;;  %3073 = vmatpush1.bf16.msra.mxu1 %v3185_v14  ;;  %v3319_v14 = vld [vmem:[#allocation3 + $0x2a4] ss:$16 sps:$4 sm:$0xff]  }
  0x7d   :  { %1257 = vmatprep.subr.bf16.mxu0 %v3531_v0  ;;  %3058 = vmatprep.subr.bf16.mxu1 %v3531_v0 }
  0x80   :  { %1258 = vmatpush1.bf16.msra.mxu0 %v3186_v15  ;;  %3074 = vmatpush1.bf16.msra.mxu1 %v3186_v15  ;;  %v3321_v15 = vld [vmem:[#allocation3 + $0x2a0] ss:$16 sps:$4 sm:$0xff]  }
  0x81   :  { %1259 = vmatprep.subr.bf16.mxu0 %v3531_v0  ;;  %3059 = vmatprep.subr.bf16.mxu1 %v3531_v0 }
  0x84   :  { %1260 = vmatpush1.bf16.msra.mxu0 %v3187_v16  ;;  %3075 = vmatpush1.bf16.msra.mxu1 %v3187_v16  ;;  %v3243_v16 = vld [vmem:[#allocation3 + $0x28] ss:$16 sps:$4 sm:$0xff]  }
  0x85   :  { %1261 = vmatprep.subr.bf16.mxu0 %v3531_v0  ;;  %3060 = vmatprep.subr.bf16.mxu1 %v3531_v0 }
  0x88   :  { %1262 = vmatpush1.bf16.msra.mxu0 %v3188_v17  ;;  %3076 = vmatpush1.bf16.msra.mxu1 %v3188_v17  ;;  %v3244_v17 = vld [vmem:[#allocation3 + $0x4c] ss:$16 sps:$4 sm:$0xff]  }
  0x89   :  { %1520 = vmatprep.subr.bf16.mxu0 %v3531_v0 }
  0x8b   :  { %1264 = vmatmul.mubr.bf16.vlgmr.msra.gmra.mrb[0].mxu0 %v3189_v18  ;;  %1352 = vmatmul.mubr.bf16.vlgmr.msra.gmra.mrb[0].mxu1 %v3259_v25  ;;  %v3325_v18 = vld [vmem:[#allocation3 + $0x2c4] ss:$16 sps:$4 sm:$0xff]   ;;  %v3250_v25 = vld [vmem:[#allocation3 + $0x8c] ss:$16 sps:$4 sm:$0xff]  }
  0x8c   :  { %1521 = vmatpush1.bf16.msra.mxu0 %v3192_v19  ;;  %1271 = vmatprep.mubr.bf16.mxu0 %v3193_v20  ;;  %v3327_v19 = vld [vmem:[#allocation3 + $0x2c0] ss:$16 sps:$4 sm:$0xff]   ;;  %v3246_v20 = vld [vmem:[#allocation3 + $0x48] ss:$16 sps:$4 sm:$0xff]  }
  0x8d   :  { %1522 = vmatprep.subr.bf16.mxu0 %v3531_v0  ;;  %1359 = vmatprep.mubr.bf16.mxu1 %v3265_v31  ;;  %v3345_v31 = vld [vmem:[#allocation3 + $0x320] ss:$16 sps:$4 sm:$0xff]  }
  0x90   :  { %1523 = vmatpush1.bf16.msra.mxu0 %v3195_v21  ;;  %v3247_v21 = vld [vmem:[#allocation3 + $0x6c] ss:$16 sps:$4 sm:$0xff]  }
  0x91   :  { %1524 = vmatprep.subr.bf16.mxu0 %v3531_v0 }
  0x93   :  { %1272 = vmatmul.mubr.bf16.gmra.mrb[4].mxu0 %v3196_v22  ;;  %1360 = vmatmul.mubr.bf16.gmra.mrb[4].mxu1 %v3267_v32  ;;  %v3331_v22 = vld [vmem:[#allocation3 + $0x2e4] ss:$16 sps:$4 sm:$0xff]   ;;  %v3255_v32 = vld [vmem:[#allocation3 + $0xa8] ss:$16 sps:$4 sm:$0xff]  }
  0x94   :  { %1525 = vmatpush1.bf16.msra.mxu0 %v3197_v23  ;;  %1279 = vmatprep.mubr.bf16.mxu0 %v3198_v24  ;;  %v3333_v23 = vld [vmem:[#allocation3 + $0x2e0] ss:$16 sps:$4 sm:$0xff]   ;;  %v3249_v24 = vld [vmem:[#allocation3 + $0x68] ss:$16 sps:$4 sm:$0xff]  }
  0x95   :  { %1526 = vmatprep.subr.bf16.mxu0 %v3531_v0  ;;  %1367 = vmatprep.mubr.bf16.mxu1 %v3271_v37  ;;  %v3262_v37 = vld [vmem:[#allocation3 + $0xec] ss:$16 sps:$4 sm:$0xff]  }
  0x98   :  { %1527 = vmatpush1.bf16.msra.mxu0 %v3201_v27  ;;  %v3339_v27 = vld [vmem:[#allocation3 + $0x300] ss:$16 sps:$4 sm:$0xff]  }
  0x99   :  { %1528 = vmatprep.subr.bf16.mxu0 %v3531_v0 }
  0x9b   :  { %1280 = vmatmul.mubr.bf16.gmra.mrb[8].mxu0 %v3200_v28  ;;  %1368 = vmatmul.mubr.bf16.gmra.mrb[8].mxu1 %v3273_v38  ;;  %v3252_v28 = vld [vmem:[#allocation3 + $0x88] ss:$16 sps:$4 sm:$0xff]   ;;  %v3355_v38 = vld [vmem:[#allocation8] sm:$0xff]  }
  0x9c   :  { %1287 = vmatprep.mubr.bf16.mxu0 %v3202_v29  ;;  %1529 = vmatpush1.bf16.msra.mxu0 %v3204_v30  ;;  %v3253_v29 = vld [vmem:[#allocation3 + $0xac] ss:$16 sps:$4 sm:$0xff]   ;;  %v3343_v30 = vld [vmem:[#allocation3 + $0x324] ss:$16 sps:$4 sm:$0xff]  }
  0x9d   :  { %1530 = vmatprep.subr.bf16.mxu0 %v3531_v0  ;;  %1375 = vmatprep.mubr.bf16.mxu1 %v3277_v43  ;;  %v3362_v43 = vld [vmem:[#allocation3 + $0x384] ss:$16 sps:$4 sm:$0xff]  }
  0x9e   :  { %2901 = vmatprep.subr.bf16.mxu1 %v3355_v38 }
  0x9f   :  { %2902 = vmatpush3.bf16.msra.mxu1 %v3355_v38  ;;  %v3367_v38 = vld [vmem:[#allocation3 + $0x308] ss:$16 sps:$4 sm:$0xff]  }
  0xa0   :  { %1531 = vmatpush1.bf16.msra.mxu0 %v3206_v33  ;;  %v3256_v33 = vld [vmem:[#allocation3 + $0xcc] ss:$16 sps:$4 sm:$0xff]  }
  0xa1   :  { %1532 = vmatprep.subr.bf16.mxu0 %v3531_v0 }
  0xa3   :  { %1288 = vmatmul.mubr.bf16.gmra.mrb[12].mxu0 %v3205_v34  ;;  %1376 = vmatmul.mubr.bf16.gmra.mrb[12].mxu1 %v3279_v44  ;;  %v3349_v34 = vld [vmem:[#allocation3 + $0x344] ss:$16 sps:$4 sm:$0xff]   ;;  %v3364_v44 = vld [vmem:[#allocation3 + $0x380] ss:$16 sps:$4 sm:$0xff]  }
  0xa4   :  { %1295 = vmatprep.mubr.bf16.mxu0 %v3207_v35  ;;  %1533 = vmatpush1.bf16.msra.mxu0 %v3210_v36  ;;  %v3351_v35 = vld [vmem:[#allocation3 + $0x340] ss:$16 sps:$4 sm:$0xff]   ;;  %v3258_v36 = vld [vmem:[#allocation3 + $0xc8] ss:$16 sps:$4 sm:$0xff]  }
  0xa5   :  { %1534 = vmatprep.subr.bf16.mxu0 %v3531_v0  ;;  %1383 = vmatprep.mubr.bf16.mxu1 %v3283_v49  ;;  %v3371_v49 = vld [vmem:[#allocation3 + $0x3a0] ss:$16 sps:$4 sm:$0xff]  }
  0xa8   :  { %1535 = vmatpush1.bf16.msra.mxu0 %v3214_v39  ;;  %v3356_v39 = vld [vmem:[#allocation3 + $0x364] ss:$16 sps:$4 sm:$0xff]  }
  0xa9   :  { %1536 = vmatprep.subr.bf16.mxu0 %v3531_v0 }
  0xab   :  { %1296 = vmatmul.mubr.bf16.gmra.mrb[16].mxu0 %v3209_v40  ;;  %1384 = vmatmul.mubr.bf16.gmra.mrb[16].mxu1 %v3285_v50  ;;  %v3358_v40 = vld [vmem:[#allocation3 + $0x360] ss:$16 sps:$4 sm:$0xff]   ;;  %v3276_v50 = vld [vmem:[#allocation3 + $0x128] ss:$16 sps:$4 sm:$0xff]  }
  0xac   :  { %1303 = vmatprep.mubr.bf16.mxu0 %v3211_v41  ;;  %1537 = vmatpush1.bf16.msra.mxu0 %v3215_v42  ;;  %v3264_v41 = vld [vmem:[#allocation3 + $0xe8] ss:$16 sps:$4 sm:$0xff]   ;;  %v3268_v42 = vld [vmem:[#allocation3 + $0x10c] ss:$16 sps:$4 sm:$0xff]  }
  0xad   :  { %1538 = vmatprep.subr.bf16.mxu0 %v3531_v0  ;;  %1391 = vmatprep.mubr.bf16.mxu1 %v3289_v55  ;;  %v3379_v55 = vld [vmem:[#allocation3 + $0x3c0] ss:$16 sps:$4 sm:$0xff]  }
  0xb0   :  { %1539 = vmatpush1.bf16.msra.mxu0 %v3219_v45  ;;  %v3270_v45 = vld [vmem:[#allocation3 + $0x108] ss:$16 sps:$4 sm:$0xff]  }
  0xb1   :  { %1540 = vmatprep.subr.bf16.mxu0 %v3531_v0 }
  0xb3   :  { %1304 = vmatmul.mubr.bf16.gmra.mrb[20].mxu0 %v3213_v46  ;;  %1392 = vmatmul.mubr.bf16.gmra.mrb[20].mxu1 %v3291_v56  ;;  %v3274_v46 = vld [vmem:[#allocation3 + $0x12c] ss:$16 sps:$4 sm:$0xff]   ;;  %v3282_v56 = vld [vmem:[#allocation3 + $0x148] ss:$16 sps:$4 sm:$0xff]  }
  0xb4   :  { %1311 = vmatprep.mubr.bf16.mxu0 %v3216_v47  ;;  %1541 = vmatpush1.bf16.msra.mxu0 %v3223_v48  ;;  %v3368_v47 = vld [vmem:[#allocation8 + $0x8] sm:$0xff]   ;;  %v3369_v48 = vld [vmem:[#allocation3 + $0x3a4] ss:$16 sps:$4 sm:$0xff]  }
  0xb5   :  { %1542 = vmatprep.subr.bf16.mxu0 %v3531_v0  ;;  %1399 = vmatprep.mubr.bf16.mxu1 %v3295_v61  ;;  %v3385_v61 = vld [vmem:[#allocation3 + $0x3e4] ss:$16 sps:$4 sm:$0xff]  }
  0xb6   :  { %2903 = vmatprep.subr.bf16.mxu1 %v3368_v47 }
  0xb7   :  { %2904 = vmatpush3.bf16.msra.mxu1 %v3368_v47 }
  0xb8   :  { %1543 = vmatpush1.bf16.msra.mxu0 %v3224_v51  ;;  %v3280_v51 = vld [vmem:[#allocation3 + $0x14c] ss:$16 sps:$4 sm:$0xff]  }
  0xb9   :  { %1544 = vmatprep.subr.bf16.mxu0 %v3531_v0 }
  0xbb   :  { %1312 = vmatmul.mubr.bf16.gmra.mrb[24].mxu0 %v3218_v52  ;;  %1400 = vmatmul.mubr.bf16.gmra.mrb[24].mxu1 %v3297_v62  ;;  %v3375_v52 = vld [vmem:[#allocation8 + $0x10] sm:$0xff]   ;;  %v3292_v62 = vld [vmem:[#allocation3 + $0x18c] ss:$16 sps:$4 sm:$0xff]  }
  0xbc   :  { %1319 = vmatprep.mubr.bf16.mxu0 %v3220_v53  ;;  %1545 = vmatpush1.bf16.msra.mxu0 %v3228_v54  ;;  %v3376_v53 = vld [vmem:[#allocation8 + $0x18] sm:$0xff]   ;;  %v3377_v54 = vld [vmem:[#allocation3 + $0x3c4] ss:$16 sps:$4 sm:$0xff]  }
  0xbd   :  { %1546 = vmatprep.subr.bf16.mxu0 %v3531_v0  ;;  %1407 = vmatprep.mubr.bf16.mxu1 %v3301_v3  ;;  %v3294_v3 = vld [vmem:[#allocation3 + $0x188] ss:$16 sps:$4 sm:$0xff]  }
  0xbe   :  { %2905 = vmatprep.subr.bf16.mxu1 %v3375_v52 }
  0xbf   :  { %2906 = vmatpush3.bf16.msra.mxu1 %v3375_v52 }
  0xc0   :  { %1547 = vmatpush1.bf16.msra.mxu0 %v3232_v57  ;;  %2907 = vmatprep.subr.bf16.mxu1 %v3376_v53  ;;  %v3286_v57 = vld [vmem:[#allocation3 + $0x16c] ss:$16 sps:$4 sm:$0xff]  }
  0xc1   :  { %1548 = vmatprep.subr.bf16.mxu0 %v3531_v0 }
  0xc3   :  { %1320 = vmatmul.mubr.bf16.gmra.mrb[28].mxu0 %v3222_v58  ;;  %1408 = vmatmul.mubr.bf16.gmra.mrb[28].mxu1 %v3303_v4  ;;  %v3383_v58 = vld [vmem:[#allocation8 + $0x20] sm:$0xff]   ;;  %v3298_v4 = vld [vmem:[#allocation3 + $0x1ac] ss:$16 sps:$4 sm:$0xff]  }
  0xc4   :  { %1327 = vmatprep.mubr.bf16.mxu0 %v3225_v59  ;;  %1549 = vmatpush1.bf16.msra.mxu0 %v3233_v60  ;;  %v3384_v59 = vld [vmem:[#allocation8 + $0x28] sm:$0xff]  }
  0xc5   :  { %1550 = vmatprep.subr.bf16.mxu0 %v3531_v0  ;;  %1415 = vmatprep.mubr.bf16.mxu1 %v3307_v7  ;;  %v3236_v0 = vld [vmem:[#allocation3 + $0x140] ss:$16 sps:$4 sm:$0xff]   ;;  %v3288_v60 = vld [vmem:[#allocation3 + $0x168] ss:$16 sps:$4 sm:$0xff]  }
  0xc6   :  { %2908 = vmatpush3.bf16.msra.mxu1 %v3376_v53  ;;  %v3306_v7 = vld [vmem:[#allocation3 + $0x1c8] ss:$16 sps:$4 sm:$0xff]  }
  0xc7   :  { %2909 = vmatprep.subr.bf16.mxu1 %v3383_v58 }
  0xc8   :  { %1551 = vmatpush1.bf16.msra.mxu0 %v3237_v63  ;;  %v3387_v63 = vld [vmem:[#allocation3 + $0x3e0] ss:$16 sps:$4 sm:$0xff]  }
  0xca   :  { %2910 = vmatpush3.bf16.msra.mxu1 %v3383_v58  ;;  %v3390_v58 = vld [vmem:[#allocation3 + $0x368] ss:$16 sps:$4 sm:$0xff]  }
  0xcb   :  { %1328 = vmatmul.mubr.bf16.gmra.mrb[32].mxu0 %v3227_v1  ;;  %1416 = vmatmul.mubr.bf16.gmra.mrb[32].mxu1 %v3309_v8  ;;  %v3391_v1 = vld [vmem:[#allocation8 + $0x30] sm:$0xff]   ;;  %v3310_v8 = vld [vmem:[#allocation3 + $0x1ec] ss:$16 sps:$4 sm:$0xff]  }
  0xcc   :  { %1335 = vmatprep.mubr.bf16.mxu0 %v3229_v2  ;;  %1423 = vmatprep.mubr.bf16.mxu1 %v3313_v10  ;;  %v3392_v2 = vld [vmem:[#allocation8 + $0x38] sm:$0xff]  }
  0xcd   :  { %2911 = vmatprep.subr.bf16.mxu1 %v3384_v59  ;;  %v3318_v10 = vld [vmem:[#allocation3 + $0x208] ss:$16 sps:$4 sm:$0xff]  }
  0xce   :  { %2912 = vmatpush3.bf16.msra.mxu1 %v3384_v59 }
  0xcf   :  { %2913 = vmatprep.subr.bf16.mxu1 %v3391_v1 }
  0xd2   :  { %2914 = vmatpush3.bf16.msra.mxu1 %v3391_v1 }
  0xd3   :  { %1336 = vmatmul.mubr.bf16.gmra.mrb[36].mxu0 %v3231_v5  ;;  %1424 = vmatmul.mubr.bf16.gmra.mrb[36].mxu1 %v3315_v11  ;;  %v3300_v5 = vld [vmem:[#allocation3 + $0x1a8] ss:$16 sps:$4 sm:$0xff]   ;;  %v3322_v11 = vld [vmem:[#allocation3 + $0x22c] ss:$16 sps:$4 sm:$0xff]  }
  0xd4   :  { %1343 = vmatprep.mubr.bf16.mxu0 %v3234_v6  ;;  %1431 = vmatprep.mubr.bf16.mxu1 %v3319_v14  ;;  %v3304_v6 = vld [vmem:[#allocation3 + $0x1cc] ss:$16 sps:$4 sm:$0xff]   ;;  %v3330_v14 = vld [vmem:[#allocation3 + $0x248] ss:$16 sps:$4 sm:$0xff]  }
  0xd5   :  { %2915 = vmatprep.subr.bf16.mxu1 %v3392_v2 }
  0xd6   :  { %2916 = vmatpush3.bf16.msra.mxu1 %v3392_v2 }
  0xdb   :  { %1344 = vmatmul.mubr.bf16.gmra.mrb[40].mxu0 %v3236_v0  ;;  %1432 = vmatmul.mubr.bf16.gmra.mrb[40].mxu1 %v3321_v15  ;;  %v3312_v0 = vld [vmem:[#allocation3 + $0x1e8] ss:$16 sps:$4 sm:$0xff]   ;;  %v3334_v15 = vld [vmem:[#allocation3 + $0x26c] ss:$16 sps:$4 sm:$0xff]  }
  0xdc   :  { %1552 = vmatprep.mubr.bf16.mxu0 %v3240_v9  ;;  %1439 = vmatprep.mubr.bf16.mxu1 %v3325_v18  ;;  %v3316_v9 = vld [vmem:[#allocation3 + $0x20c] ss:$16 sps:$4 sm:$0xff]   ;;  %v3342_v18 = vld [vmem:[#allocation3 + $0x288] ss:$16 sps:$4 sm:$0xff]  }
  0xe3   :  { %1553 = vmatmul.mubr.bf16.vlgmr.msra.gmra.mrb[0].mxu0 %v3238_v12  ;;  %1440 = vmatmul.mubr.bf16.gmra.mrb[44].mxu1 %v3327_v19  ;;  %v3324_v12 = vld [vmem:[#allocation3 + $0x228] ss:$16 sps:$4 sm:$0xff]   ;;  %v3346_v19 = vld [vmem:[#allocation3 + $0x2ac] ss:$16 sps:$4 sm:$0xff]  }
  0xe4   :  { %1560 = vmatprep.mubr.bf16.mxu0 %v3241_v13  ;;  %1447 = vmatprep.mubr.bf16.mxu1 %v3331_v22  ;;  %v3328_v13 = vld [vmem:[#allocation3 + $0x24c] ss:$16 sps:$4 sm:$0xff]  }
  0xeb   :  { %1561 = vmatmul.mubr.bf16.gmra.mrb[4].mxu0 %v3243_v16  ;;  %1448 = vmatmul.mubr.bf16.gmra.mrb[48].mxu1 %v3333_v23  ;;  %v3336_v16 = vld [vmem:[#allocation3 + $0x268] ss:$16 sps:$4 sm:$0xff]  }
  0xec   :  { %1568 = vmatprep.mubr.bf16.mxu0 %v3244_v17  ;;  %1455 = vmatprep.mubr.bf16.mxu1 %v3337_v26  ;;  %v3340_v17 = vld [vmem:[#allocation3 + $0x28c] ss:$16 sps:$4 sm:$0xff]   ;;  %v3354_v26 = vld [vmem:[#allocation3 + $0x2c8] ss:$16 sps:$4 sm:$0xff]  }
  0xf3   :  { %1569 = vmatmul.mubr.bf16.gmra.mrb[8].mxu0 %v3246_v20  ;;  %1456 = vmatmul.mubr.bf16.gmra.mrb[52].mxu1 %v3339_v27  ;;  %v3348_v20 = vld [vmem:[#allocation3 + $0x2a8] ss:$16 sps:$4 sm:$0xff]   ;;  %v3359_v27 = vld [vmem:[#allocation3 + $0x2ec] ss:$16 sps:$4 sm:$0xff]  }
  0xf4   :  { %1576 = vmatprep.mubr.bf16.mxu0 %v3247_v21  ;;  %1463 = vmatprep.mubr.bf16.mxu1 %v3343_v30  ;;  %v3352_v21 = vld [vmem:[#allocation3 + $0x2cc] ss:$16 sps:$4 sm:$0xff]  }
  0xfb   :  { %1577 = vmatmul.mubr.bf16.gmra.mrb[12].mxu0 %v3249_v24  ;;  %1464 = vmatmul.mubr.bf16.gmra.mrb[56].mxu1 %v3345_v31 }
  0xfc   :  { %1584 = vmatprep.mubr.bf16.mxu0 %v3250_v25  ;;  %1471 = vmatprep.mubr.bf16.mxu1 %v3349_v34 }
 0x103   :  { %1585 = vmatmul.mubr.bf16.gmra.mrb[16].mxu0 %v3252_v28  ;;  %1472 = vmatmul.mubr.bf16.gmra.mrb[60].mxu1 %v3351_v35 }
 0x104   :  { %1592 = vmatprep.mubr.bf16.mxu0 %v3253_v29  ;;  %1479 = vmatprep.mubr.bf16.mxu1 %v3356_v39  ;;  %v3372_v39 = vld [vmem:[#allocation3 + $0x32c] ss:$16 sps:$4 sm:$0xff]  }
 0x10b   :  { %1593 = vmatmul.mubr.bf16.gmra.mrb[20].mxu0 %v3255_v32  ;;  %1480 = vmatmul.mubr.bf16.gmra.mrb[64].mxu1 %v3358_v40  ;;  %v3361_v32 = vld [vmem:[#allocation3 + $0x2e8] ss:$16 sps:$4 sm:$0xff]  }
 0x10c   :  { %1600 = vmatprep.mubr.bf16.mxu0 %v3256_v33  ;;  %1487 = vmatprep.mubr.bf16.mxu1 %v3362_v43  ;;  %v3365_v33 = vld [vmem:[#allocation3 + $0x30c] ss:$16 sps:$4 sm:$0xff]  }
 0x113   :  { %1601 = vmatmul.mubr.bf16.gmra.mrb[24].mxu0 %v3258_v36  ;;  %1488 = vmatmul.mubr.bf16.gmra.mrb[68].mxu1 %v3364_v44  ;;  %v3374_v44 = vld [vmem:[#allocation3 + $0x328] ss:$16 sps:$4 sm:$0xff]  }
 0x114   :  { %1608 = vmatprep.mubr.bf16.mxu0 %v3262_v37  ;;  %1495 = vmatprep.mubr.bf16.mxu1 %v3369_v48 }
 0x11b   :  { %1609 = vmatmul.mubr.bf16.gmra.mrb[28].mxu0 %v3264_v41  ;;  %1496 = vmatmul.mubr.bf16.gmra.mrb[72].mxu1 %v3371_v49 }
 0x11c   :  { %1616 = vmatprep.mubr.bf16.mxu0 %v3268_v42  ;;  %1503 = vmatprep.mubr.bf16.mxu1 %v3377_v54 }
 0x123   :  { %1617 = vmatmul.mubr.bf16.gmra.mrb[32].mxu0 %v3270_v45  ;;  %1504 = vmatmul.mubr.bf16.gmra.mrb[76].mxu1 %v3379_v55  ;;  %v3380_v45 = vld [vmem:[#allocation3 + $0x34c] ss:$16 sps:$4 sm:$0xff]  }
 0x124   :  { %1624 = vmatprep.mubr.bf16.mxu0 %v3274_v46  ;;  %1511 = vmatprep.mubr.bf16.mxu1 %v3385_v61 }
 0x12b   :  { %1625 = vmatmul.mubr.bf16.gmra.mrb[36].mxu0 %v3276_v50  ;;  %1512 = vmatmul.mubr.bf16.gmra.mrb[80].mxu1 %v3387_v63  ;;  %v3382_v50 = vld [vmem:[#allocation3 + $0x348] ss:$16 sps:$4 sm:$0xff]  }
 0x12c   :  { %1632 = vmatprep.mubr.bf16.mxu0 %v3280_v51  ;;  %v3388_v51 = vld [vmem:[#allocation3 + $0x36c] ss:$16 sps:$4 sm:$0xff]  }
 0x133   :  { %1633 = vmatmul.mubr.bf16.gmra.mrb[40].mxu0 %v3282_v56 }
 0x134   :  { %1640 = vmatprep.mubr.bf16.mxu0 %v3286_v57 }
 0x13b   :  { %1641 = vmatmul.mubr.bf16.gmra.mrb[44].mxu0 %v3288_v60  ;;  %v3393_v60 = vld [vmem:[#allocation3 + $0x38c] ss:$16 sps:$4 sm:$0xff]  }
 0x13c   :  { %1648 = vmatprep.mubr.bf16.mxu0 %v3292_v62 }
 0x143   :  { %1649 = vmatmul.mubr.bf16.gmra.mrb[48].mxu0 %v3294_v3 }
 0x144   :  { %1656 = vmatprep.mubr.bf16.mxu0 %v3298_v4 }
 0x14b   :  { %1657 = vmatmul.mubr.bf16.gmra.mrb[52].mxu0 %v3300_v5 }
 0x14c   :  { %1664 = vmatprep.mubr.bf16.mxu0 %v3304_v6  ;;  %v3395_v6 = vld [vmem:[#allocation3 + $0x388] ss:$16 sps:$4 sm:$0xff]  }
 0x153   :  { %1665 = vmatmul.mubr.bf16.gmra.mrb[56].mxu0 %v3306_v7 }
 0x154   :  { %1672 = vmatprep.mubr.bf16.mxu0 %v3310_v8  ;;  %v3396_v8 = vld [vmem:[#allocation3 + $0x3ac] ss:$16 sps:$4 sm:$0xff]  }
 0x15b   :  { %1673 = vmatmul.mubr.bf16.gmra.mrb[60].mxu0 %v3312_v0 }
 0x15c   :  { %1680 = vmatprep.mubr.bf16.mxu0 %v3316_v9 }
 0x15e   :  { %v3665_v22 = vpop.f32.mrb[0].mxu1 }
 0x15f   :  { %v1355_v23 = vpop.f32.mrb[1].mxu1 }
 0x160   :  { %v3667_v24 = vpop.f32.mrb[2].mxu1 }
 0x161   :  { %v1358_v25 = vpop.f32.mrb[3].mxu1 }
 0x163   :  { %1681 = vmatmul.mubr.bf16.gmra.mrb[64].mxu0 %v3318_v10 }
 0x164   :  { %1688 = vmatprep.mubr.bf16.mxu0 %v3322_v11 }
 0x166   :  { %v3669_v28 = vpop.f32.mrb[4].mxu1 }
 0x167   :  { %v1363_v29 = vpop.f32.mrb[5].mxu1 }
 0x168   :  { %v3671_v30 = vpop.f32.mrb[6].mxu1 }
 0x169   :  { %v1366_v31 = vpop.f32.mrb[7].mxu1 }
 0x16a   :  { %v3401_v31 = vld [vmem:[#allocation3 + $0x3c8] ss:$16 sps:$4 sm:$0xff]  }
 0x16b   :  { %1689 = vmatmul.mubr.bf16.gmra.mrb[68].mxu0 %v3324_v12 }
 0x16c   :  { %1696 = vmatprep.mubr.bf16.mxu0 %v3328_v13 }
 0x16e   :  { %v3673_v34 = vpop.f32.mrb[8].mxu1 }
 0x16f   :  { %v1371_v35 = vpop.f32.mrb[9].mxu1 }
 0x170   :  { %v3675_v36 = vpop.f32.mrb[10].mxu1 }
 0x171   :  { %v1374_v37 = vpop.f32.mrb[11].mxu1 }
 0x173   :  { %1697 = vmatmul.mubr.bf16.gmra.mrb[72].mxu0 %v3330_v14 }
 0x174   :  { %1704 = vmatprep.mubr.bf16.mxu0 %v3334_v15 }
 0x176   :  { %v3677_v40 = vpop.f32.mrb[12].mxu1 }
 0x177   :  { %v1379_v41 = vpop.f32.mrb[13].mxu1 }
 0x178   :  { %v3679_v42 = vpop.f32.mrb[14].mxu1 }
 0x179   :  { %v1382_v43 = vpop.f32.mrb[15].mxu1 }
 0x17b   :  { %1705 = vmatmul.mubr.bf16.gmra.mrb[76].mxu0 %v3336_v16  ;;  %v3398_v16 = vld [vmem:[#allocation3 + $0x3a8] ss:$16 sps:$4 sm:$0xff]  }
 0x17c   :  { %1712 = vmatprep.mubr.bf16.mxu0 %v3340_v17 }
 0x17e   :  { %v3681_v46 = vpop.f32.mrb[16].mxu1 }
 0x17f   :  { %v1387_v47 = vpop.f32.mrb[17].mxu1 }
 0x180   :  { %v3683_v48 = vpop.f32.mrb[18].mxu1  ;;  %v3404_v47 = vld [vmem:[#allocation3 + $0x3e8] ss:$16 sps:$4 sm:$0xff]  }
 0x181   :  { %v1390_v49 = vpop.f32.mrb[19].mxu1 }
 0x183   :  { %1713 = vmatmul.mubr.bf16.gmra.mrb[80].mxu0 %v3342_v18  ;;  %v3399_v18 = vld [vmem:[#allocation3 + $0x3cc] ss:$16 sps:$4 sm:$0xff]  }
 0x184   :  { %1720 = vmatprep.mubr.bf16.mxu0 %v3346_v19 }
 0x186   :  { %v3685_v52 = vpop.f32.mrb[20].mxu1 }
 0x187   :  { %v1395_v53 = vpop.f32.mrb[21].mxu1 }
 0x188   :  { %v3687_v54 = vpop.f32.mrb[22].mxu1 }
 0x189   :  { %v1398_v56 = vpop.f32.mrb[23].mxu1 }
 0x18b   :  { %1721 = vmatmul.mubr.bf16.gmra.mrb[84].mxu0 %v3348_v20 }
 0x18c   :  { %1728 = vmatprep.mubr.bf16.mxu0 %v3352_v21 }
 0x18e   :  { %v3689_v63 = vpop.f32.mrb[24].mxu1 }
 0x18f   :  { %v1403_v1 = vpop.f32.mrb[25].mxu1 }
 0x190   :  { %v3691_v2 = vpop.f32.mrb[26].mxu1 }
 0x191   :  { %v1406_v4 = vpop.f32.mrb[27].mxu1 }
 0x193   :  { %1729 = vmatmul.mubr.bf16.gmra.mrb[88].mxu0 %v3354_v26 }
 0x194   :  { %1736 = vmatprep.mubr.bf16.mxu0 %v3359_v27 }
 0x196   :  { %v3693_v10 = vpop.f32.mrb[28].mxu1 }
 0x197   :  { %v1411_v11 = vpop.f32.mrb[29].mxu1 }
 0x198   :  { %v3695_v12 = vpop.f32.mrb[30].mxu1 }
 0x199   :  { %v1414_v14 = vpop.f32.mrb[31].mxu1 }
 0x19b   :  { %1737 = vmatmul.mubr.bf16.gmra.mrb[92].mxu0 %v3361_v32 }
 0x19c   :  { %1744 = vmatprep.mubr.bf16.mxu0 %v3365_v33  ;;  %v3402_v33 = vld [vmem:[#allocation3 + $0x3ec] ss:$16 sps:$4 sm:$0xff]  }
 0x19e   :  { %v3697_v21 = vpop.f32.mrb[32].mxu1 }
 0x19f   :  { %v1419_v23 = vpop.f32.mrb[33].mxu1 }
 0x1a0   :  { %v3699_v25 = vpop.f32.mrb[34].mxu1 }
 0x1a1   :  { %v1422_v27 = vpop.f32.mrb[35].mxu1 }
 0x1a3   :  { %1745 = vmatmul.mubr.bf16.gmra.mrb[96].mxu0 %v3367_v38 }
 0x1a4   :  { %1752 = vmatprep.mubr.bf16.mxu0 %v3372_v39 }
 0x1a6   :  { %v3701_v38 = vpop.f32.mrb[36].mxu1 }
 0x1a7   :  { %v1427_v39 = vpop.f32.mrb[37].mxu1 }
 0x1a8   :  { %v3703_v41 = vpop.f32.mrb[38].mxu1 }
 0x1ab   :  { %1753 = vmatmul.mubr.bf16.gmra.mrb[100].mxu0 %v3374_v44  ;;  %v1430_v44 = vpop.f32.mrb[39].mxu1 }
 0x1ac   :  { %1760 = vmatprep.mubr.bf16.mxu0 %v3380_v45 }
 0x1ae   :  { %v3705_v53 = vpop.f32.mrb[40].mxu1 }
 0x1b3   :  { %1761 = vmatmul.mubr.bf16.gmra.mrb[104].mxu0 %v3382_v50 }
 0x1b4   :  { %1768 = vmatprep.mubr.bf16.mxu0 %v3388_v51 }
 0x1b6   :  { %v1554_v55 = vpop.f32.mrb[0].mxu0 }
 0x1b7   :  { %v1556_v57 = vpop.f32.mrb[1].mxu0 }
 0x1b8   :  { %v1557_v59 = vpop.f32.mrb[2].mxu0 }
 0x1b9   :  { %v2004_v61 = vpack.c.bf16 %v1557_v59, %v1554_v55  ;;  %v1559_v62 = vpop.f32.mrb[3].mxu0  ;;  %v1435_v55 = vpop.f32.mrb[41].mxu1 }
 0x1ba   :  { %v3707_v56 = vpop.f32.mrb[42].mxu1 }
 0x1bb   :  { %1769 = vmatmul.mubr.bf16.gmra.mrb[108].mxu0 %v3390_v58  ;;  %2917 = vmatprep.mubr.bf16.mxu1 %v2004_v61  ;;  %v1438_v58 = vpop.f32.mrb[43].mxu1 }
 0x1bc   :  { %1776 = vmatprep.mubr.bf16.mxu0 %v3393_v60  ;;  %v3709_v1 = vpop.f32.mrb[44].mxu1 }
 0x1be   :  { %v1562_v3 = vpop.f32.mrb[4].mxu0 }
 0x1bf   :  { %v1564_v5 = vpop.f32.mrb[5].mxu0 }
 0x1c0   :  { %v1565_v7 = vpop.f32.mrb[6].mxu0 }
 0x1c1   :  { %v2005_v0 = vpack.c.bf16 %v1565_v7, %v1562_v3  ;;  %v1567_v9 = vpop.f32.mrb[7].mxu0  ;;  %v1443_v3 = vpop.f32.mrb[45].mxu1 }
 0x1c2   :  { %v3711_v4 = vpop.f32.mrb[46].mxu1 }
 0x1c3   :  { %1777 = vmatmul.mubr.bf16.gmra.mrb[112].mxu0 %v3395_v6  ;;  %2918 = vmatmul.mubr.bf16.vlgmr.msra.gmra.mrb[84].mxu1 %v2005_v0  ;;  %v1446_v6 = vpop.f32.mrb[47].mxu1 }
 0x1c4   :  { %1784 = vmatprep.mubr.bf16.mxu0 %v3396_v8  ;;  %v3713_v11 = vpop.f32.mrb[48].mxu1 }
 0x1c6   :  { %v1570_v13 = vpop.f32.mrb[8].mxu0 }
 0x1c7   :  { %v1572_v15 = vpop.f32.mrb[9].mxu0 }
 0x1c8   :  { %v1573_v17 = vpop.f32.mrb[10].mxu0 }
 0x1c9   :  { %v2006_v19 = vpack.c.bf16 %v1573_v17, %v1570_v13  ;;  %v1575_v20 = vpop.f32.mrb[11].mxu0  ;;  %v1451_v13 = vpop.f32.mrb[49].mxu1 }
 0x1ca   :  { %v3715_v14 = vpop.f32.mrb[50].mxu1 }
 0x1cb   :  { %1785 = vmatmul.mubr.bf16.gmra.mrb[116].mxu0 %v3398_v16  ;;  %2921 = vmatprep.mubr.bf16.mxu1 %v2006_v19  ;;  %v1454_v16 = vpop.f32.mrb[51].mxu1 }
 0x1cc   :  { %1792 = vmatprep.mubr.bf16.mxu0 %v3399_v18  ;;  %v3717_v23 = vpop.f32.mrb[52].mxu1 }
 0x1ce   :  { %v1578_v26 = vpop.f32.mrb[12].mxu0 }
 0x1cf   :  { %v1580_v29 = vpop.f32.mrb[13].mxu0 }
 0x1d0   :  { %v1581_v32 = vpop.f32.mrb[14].mxu0 }
 0x1d1   :  { %v2007_v35 = vpack.c.bf16 %v1581_v32, %v1578_v26  ;;  %v1583_v37 = vpop.f32.mrb[15].mxu0  ;;  %v1459_v26 = vpop.f32.mrb[53].mxu1 }
 0x1d2   :  { %v3719_v27 = vpop.f32.mrb[54].mxu1 }
 0x1d3   :  { %1793 = vmatmul.mubr.bf16.gmra.mrb[120].mxu0 %v3401_v31  ;;  %2922 = vmatmul.mubr.bf16.gmra.mrb[88].mxu1 %v2007_v35  ;;  %v1462_v31 = vpop.f32.mrb[55].mxu1 }
 0x1d4   :  { %1800 = vmatprep.mubr.bf16.mxu0 %v3402_v33  ;;  %v3721_v39 = vpop.f32.mrb[56].mxu1 }
 0x1d6   :  { %v1586_v43 = vpop.f32.mrb[16].mxu0 }
 0x1d7   :  { %v1588_v45 = vpop.f32.mrb[17].mxu0 }
 0x1d8   :  { %v1589_v49 = vpop.f32.mrb[18].mxu0 }
 0x1d9   :  { %v2008_v50 = vpack.c.bf16 %v1589_v49, %v1586_v43  ;;  %v1591_v51 = vpop.f32.mrb[19].mxu0  ;;  %v1467_v43 = vpop.f32.mrb[57].mxu1 }
 0x1da   :  { %v3723_v44 = vpop.f32.mrb[58].mxu1 }
 0x1db   :  { %1801 = vmatmul.mubr.bf16.gmra.mrb[124].mxu0 %v3404_v47  ;;  %2925 = vmatprep.mubr.bf16.mxu1 %v2008_v50  ;;  %v1470_v45 = vpop.f32.mrb[59].mxu1 }
 0x1dc   :  { %v3725_v49 = vpop.f32.mrb[60].mxu1 }
 0x1dd   :  { %v1475_v51 = vpop.f32.mrb[61].mxu1 }
 0x1de   :  { %v1594_v57 = vpop.f32.mrb[20].mxu0 }
 0x1df   :  { %v1596_v59 = vpop.f32.mrb[21].mxu0 }
 0x1e0   :  { %v1597_v60 = vpop.f32.mrb[22].mxu0 }
 0x1e1   :  { %v2009_v61 = vpack.c.bf16 %v1597_v60, %v1594_v57  ;;  %v1599_v62 = vpop.f32.mrb[23].mxu0  ;;  %v3727_v57 = vpop.f32.mrb[62].mxu1 }
 0x1e2   :  { %v1478_v60 = vpop.f32.mrb[63].mxu1 }
 0x1e3   :  { %2926 = vmatmul.mubr.bf16.gmra.mrb[92].mxu1 %v2009_v61  ;;  %v3729_v61 = vpop.f32.mrb[64].mxu1 }
 0x1e4   :  { %v1483_v62 = vpop.f32.mrb[65].mxu1 }
 0x1e5   :  { %v3731_v3 = vpop.f32.mrb[66].mxu1 }
 0x1e6   :  { %v1602_v5 = vpop.f32.mrb[24].mxu0 }
 0x1e7   :  { %v1604_v7 = vpop.f32.mrb[25].mxu0 }
 0x1e8   :  { %v1605_v8 = vpop.f32.mrb[26].mxu0 }
 0x1e9   :  { %v2010_v0 = vpack.c.bf16 %v1605_v8, %v1602_v5  ;;  %v1607_v9 = vpop.f32.mrb[27].mxu0  ;;  %v1486_v5 = vpop.f32.mrb[67].mxu1 }
 0x1ea   :  { %v3733_v7 = vpop.f32.mrb[68].mxu1 }
 0x1eb   :  { %2929 = vmatprep.mubr.bf16.mxu1 %v2010_v0  ;;  %v1491_v0 = vpop.f32.mrb[69].mxu1 }
 0x1ec   :  { %v3735_v13 = vpop.f32.mrb[70].mxu1 }
 0x1ee   :  { %v1610_v15 = vpop.f32.mrb[28].mxu0 }
 0x1ef   :  { %v1612_v17 = vpop.f32.mrb[29].mxu0 }
 0x1f0   :  { %v1613_v18 = vpop.f32.mrb[30].mxu0  ;;  %v1494_v17 = vpop.f32.mrb[71].mxu1 }
 0x1f1   :  { %v2011_v19 = vpack.c.bf16 %v1613_v18, %v1610_v15  ;;  %v1615_v20 = vpop.f32.mrb[31].mxu0  ;;  %v3737_v18 = vpop.f32.mrb[72].mxu1 }
 0x1f3   :  { %2930 = vmatmul.mubr.bf16.gmra.mrb[96].mxu1 %v2011_v19  ;;  %v1499_v19 = vpop.f32.mrb[73].mxu1 }
 0x1f4   :  { %v3739_v20 = vpop.f32.mrb[74].mxu1 }
 0x1f5   :  { %v1502_v26 = vpop.f32.mrb[75].mxu1 }
 0x1f6   :  { %v1618_v29 = vpop.f32.mrb[32].mxu0  ;;  %v3741_v31 = vpop.f32.mrb[76].mxu1 }
 0x1f7   :  { %v1620_v32 = vpop.f32.mrb[33].mxu0 }
 0x1f8   :  { %v1621_v33 = vpop.f32.mrb[34].mxu0 }
 0x1f9   :  { %v2012_v35 = vpack.c.bf16 %v1621_v33, %v1618_v29  ;;  %v1623_v37 = vpop.f32.mrb[35].mxu0 }
 0x1fb   :  { %2933 = vmatprep.mubr.bf16.mxu1 %v2012_v35  ;;  %v1507_v35 = vpop.f32.mrb[77].mxu1 }
 0x1fc   :  { %v3744_v43 = vpop.f32.mrb[78].mxu1 }
 0x1fe   :  { %v1626_v47 = vpop.f32.mrb[36].mxu0 }
 0x1ff   :  { %v1628_v50 = vpop.f32.mrb[37].mxu0 }
 0x200   :  { %v1629_v55 = vpop.f32.mrb[38].mxu0  ;;  %v1510_v50 = vpop.f32.mrb[79].mxu1 }
 0x201   :  { %v2013_v58 = vpack.c.bf16 %v1629_v55, %v1626_v47  ;;  %v1631_v59 = vpop.f32.mrb[39].mxu0  ;;  %v3747_v51 = vpop.f32.mrb[80].mxu1 }
 0x203   :  { %2934 = vmatmul.mubr.bf16.gmra.mrb[100].mxu1 %v2013_v58  ;;  %v1515_v58 = vpop.f32.mrb[81].mxu1 }
 0x204   :  { %v3749_v59 = vpop.f32.mrb[82].mxu1 }
 0x205   :  { %v1518_v60 = vpop.f32.mrb[83].mxu1 }
 0x206   :  { %v1634_v6 = vpop.f32.mrb[40].mxu0 }
 0x207   :  { %v1636_v8 = vpop.f32.mrb[41].mxu0 }
 0x208   :  { %v1637_v9 = vpop.f32.mrb[42].mxu0 }
 0x209   :  { %v2014_v15 = vpack.c.bf16 %v1637_v9, %v1634_v6  ;;  %v1639_v16 = vpop.f32.mrb[43].mxu0 }
 0x20b   :  { %2937 = vmatprep.mubr.bf16.mxu1 %v2014_v15 }
 0x20e   :  { %v1642_v29 = vpop.f32.mrb[44].mxu0 }
 0x20f   :  { %v1643_v32 = vadd.f32 %v1642_v29, %v3665_v22  ;;  %v1644_v33 = vpop.f32.mrb[45].mxu0 }
 0x210   :  { %v1645_v37 = vpop.f32.mrb[46].mxu0 }
 0x211   :  { %v1646_v45 = vadd.f32 %v1645_v37, %v3667_v24  ;;  %v1647_v47 = vpop.f32.mrb[47].mxu0 }
 0x213   :  { %v2015_v55 = vpack.c.bf16 %v1646_v45, %v1643_v32 }
 0x215   :  { %2938 = vmatmul.mubr.bf16.gmra.mrb[104].mxu1 %v2015_v55 }
 0x216   :  { %v1650_v62 = vpop.f32.mrb[48].mxu0 }
 0x217   :  { %v1651_v22 = vadd.f32 %v1650_v62, %v3669_v28  ;;  %v1652_v5 = vpop.f32.mrb[49].mxu0 }
 0x218   :  { %v1653_v6 = vpop.f32.mrb[50].mxu0 }
 0x219   :  { %v1654_v8 = vadd.f32 %v1653_v6, %v3671_v30  ;;  %v1655_v0 = vpop.f32.mrb[51].mxu0 }
 0x21b   :  { %v2016_v9 = vpack.c.bf16 %v1654_v8, %v1651_v22 }
 0x21d   :  { %2941 = vmatprep.mubr.bf16.mxu1 %v2016_v9 }
 0x21e   :  { %v1658_v24 = vpop.f32.mrb[52].mxu0 }
 0x21f   :  { %v1659_v15 = vadd.f32 %v1658_v24, %v3673_v34  ;;  %v1660_v16 = vpop.f32.mrb[53].mxu0 }
 0x220   :  { %v1661_v17 = vpop.f32.mrb[54].mxu0 }
 0x221   :  { %v1662_v19 = vadd.f32 %v1661_v17, %v3675_v36  ;;  %v1663_v26 = vpop.f32.mrb[55].mxu0 }
 0x223   :  { %v2017_v29 = vpack.c.bf16 %v1662_v19, %v1659_v15 }
 0x225   :  { %2942 = vmatmul.mubr.bf16.gmra.mrb[108].mxu1 %v2017_v29 }
 0x226   :  { %v1666_v32 = vpop.f32.mrb[56].mxu0 }
 0x227   :  { %v1667_v28 = vadd.f32 %v1666_v32, %v3677_v40  ;;  %v1668_v33 = vpop.f32.mrb[57].mxu0 }
 0x228   :  { %v1669_v35 = vpop.f32.mrb[58].mxu0 }
 0x229   :  { %v1670_v30 = vadd.f32 %v1669_v35, %v3679_v42  ;;  %v1671_v37 = vpop.f32.mrb[59].mxu0 }
 0x22b   :  { %v2018_v45 = vpack.c.bf16 %v1670_v30, %v1667_v28 }
 0x22d   :  { %2945 = vmatprep.mubr.bf16.mxu1 %v2018_v45 }
 0x22e   :  { %v1674_v47 = vpop.f32.mrb[60].mxu0 }
 0x22f   :  { %v1675_v34 = vadd.f32 %v1674_v47, %v3681_v46  ;;  %v1676_v50 = vpop.f32.mrb[61].mxu0 }
 0x230   :  { %v1677_v55 = vpop.f32.mrb[62].mxu0 }
 0x231   :  { %v1678_v36 = vadd.f32 %v1677_v55, %v3683_v48  ;;  %v1679_v58 = vpop.f32.mrb[63].mxu0 }
 0x233   :  { %v2019_v60 = vpack.c.bf16 %v1678_v36, %v1675_v34 }
 0x235   :  { %2946 = vmatmul.mubr.bf16.gmra.mrb[112].mxu1 %v2019_v60 }
 0x236   :  { %v1682_v62 = vpop.f32.mrb[64].mxu0 }
 0x237   :  { %v1683_v40 = vadd.f32 %v1682_v62, %v3685_v52  ;;  %v1684_v22 = vpop.f32.mrb[65].mxu0 }
 0x238   :  { %v1685_v5 = vpop.f32.mrb[66].mxu0 }
 0x239   :  { %v1686_v42 = vadd.f32 %v1685_v5, %v3687_v54  ;;  %v1687_v6 = vpop.f32.mrb[67].mxu0 }
 0x23b   :  { %v2020_v8 = vpack.c.bf16 %v1686_v42, %v1683_v40 }
 0x23d   :  { %2949 = vmatprep.mubr.bf16.mxu1 %v2020_v8 }
 0x23e   :  { %v1690_v0 = vpop.f32.mrb[68].mxu0 }
 0x23f   :  { %v1691_v46 = vadd.f32 %v1690_v0, %v3689_v63  ;;  %v1692_v9 = vpop.f32.mrb[69].mxu0 }
 0x240   :  { %v1693_v24 = vpop.f32.mrb[70].mxu0 }
 0x241   :  { %v1694_v48 = vadd.f32 %v1693_v24, %v3691_v2  ;;  %v1695_v15 = vpop.f32.mrb[71].mxu0 }
 0x243   :  { %v2021_v16 = vpack.c.bf16 %v1694_v48, %v1691_v46 }
 0x245   :  { %2950 = vmatmul.mubr.bf16.gmra.mrb[116].mxu1 %v2021_v16 }
 0x246   :  { %v1698_v17 = vpop.f32.mrb[72].mxu0 }
 0x247   :  { %v1699_v52 = vadd.f32 %v1698_v17, %v3693_v10  ;;  %v1700_v19 = vpop.f32.mrb[73].mxu0 }
 0x248   :  { %v1701_v26 = vpop.f32.mrb[74].mxu0 }
 0x249   :  { %v1702_v54 = vadd.f32 %v1701_v26, %v3695_v12  ;;  %v1703_v29 = vpop.f32.mrb[75].mxu0 }
 0x24b   :  { %v2022_v32 = vpack.c.bf16 %v1702_v54, %v1699_v52 }
 0x24d   :  { %2953 = vmatprep.mubr.bf16.mxu1 %v2022_v32 }
 0x24e   :  { %v1706_v28 = vpop.f32.mrb[76].mxu0 }
 0x24f   :  { %v1707_v63 = vadd.f32 %v1706_v28, %v3697_v21  ;;  %v1708_v33 = vpop.f32.mrb[77].mxu0 }
 0x250   :  { %v1709_v35 = vpop.f32.mrb[78].mxu0 }
 0x251   :  { %v1710_v2 = vadd.f32 %v1709_v35, %v3699_v25  ;;  %v1711_v30 = vpop.f32.mrb[79].mxu0 }
 0x253   :  { %v2023_v37 = vpack.c.bf16 %v1710_v2, %v1707_v63 }
 0x255   :  { %2954 = vmatmul.mubr.bf16.gmra.mrb[120].mxu1 %v2023_v37 }
 0x256   :  { %v1714_v45 = vpop.f32.mrb[80].mxu0 }
 0x257   :  { %v1715_v10 = vadd.f32 %v1714_v45, %v3701_v38  ;;  %v1716_v47 = vpop.f32.mrb[81].mxu0 }
 0x258   :  { %v1717_v34 = vpop.f32.mrb[82].mxu0 }
 0x259   :  { %v1718_v12 = vadd.f32 %v1717_v34, %v3703_v41  ;;  %v1719_v50 = vpop.f32.mrb[83].mxu0 }
 0x25b   :  { %v2024_v55 = vpack.c.bf16 %v1718_v12, %v1715_v10 }
 0x25d   :  { %2957 = vmatprep.mubr.bf16.mxu1 %v2024_v55 }
 0x25e   :  { %v1722_v36 = vpop.f32.mrb[84].mxu0 }
 0x25f   :  { %v1723_v21 = vadd.f32 %v1722_v36, %v3705_v53  ;;  %v1724_v58 = vpop.f32.mrb[85].mxu0 }
 0x260   :  { %v1725_v60 = vpop.f32.mrb[86].mxu0 }
 0x261   :  { %v1726_v25 = vadd.f32 %v1725_v60, %v3707_v56  ;;  %v1727_v62 = vpop.f32.mrb[87].mxu0 }
 0x263   :  { %v2025_v40 = vpack.c.bf16 %v1726_v25, %v1723_v21 }
 0x265   :  { %2958 = vmatmul.mubr.bf16.gmra.mrb[124].mxu1 %v2025_v40 }
 0x266   :  { %v1730_v22 = vpop.f32.mrb[88].mxu0 }
 0x267   :  { %v1731_v38 = vadd.f32 %v1730_v22, %v3709_v1  ;;  %v1732_v5 = vpop.f32.mrb[89].mxu0 }
 0x268   :  { %v1733_v42 = vpop.f32.mrb[90].mxu0 }
 0x269   :  { %v1734_v41 = vadd.f32 %v1733_v42, %v3711_v4  ;;  %v1735_v6 = vpop.f32.mrb[91].mxu0 }
 0x26b   :  { %v2026_v8 = vpack.c.bf16 %v1734_v41, %v1731_v38 }
 0x26d   :  { %2961 = vmatprep.mubr.bf16.mxu1 %v2026_v8 }
 0x26e   :  { %v1738_v0 = vpop.f32.mrb[92].mxu0 }
 0x26f   :  { %v1739_v53 = vadd.f32 %v1738_v0, %v3713_v11  ;;  %v1740_v46 = vpop.f32.mrb[93].mxu0 }
 0x270   :  { %v1741_v9 = vpop.f32.mrb[94].mxu0 }
 0x271   :  { %v1742_v56 = vadd.f32 %v1741_v9, %v3715_v14  ;;  %v1743_v24 = vpop.f32.mrb[95].mxu0 }
 0x273   :  { %v2027_v48 = vpack.c.bf16 %v1742_v56, %v1739_v53 }
 0x275   :  { %2962 = vmatmul.mubr.bf16.gmra.mrb[128].mxu1 %v2027_v48 }
 0x276   :  { %v1746_v15 = vpop.f32.mrb[96].mxu0 }
 0x277   :  { %v1747_v1 = vadd.f32 %v1746_v15, %v3717_v23  ;;  %v1748_v16 = vpop.f32.mrb[97].mxu0 }
 0x278   :  { %v1749_v17 = vpop.f32.mrb[98].mxu0 }
 0x279   :  { %v1750_v4 = vadd.f32 %v1749_v17, %v3719_v27  ;;  %v1751_v52 = vpop.f32.mrb[99].mxu0 }
 0x27b   :  { %v2028_v19 = vpack.c.bf16 %v1750_v4, %v1747_v1 }
 0x27d   :  { %2965 = vmatprep.mubr.bf16.mxu1 %v2028_v19 }
 0x27e   :  { %v1754_v26 = vpop.f32.mrb[100].mxu0 }
 0x27f   :  { %v1755_v11 = vadd.f32 %v1754_v26, %v3721_v39  ;;  %v1756_v54 = vpop.f32.mrb[101].mxu0 }
 0x280   :  { %v1757_v29 = vpop.f32.mrb[102].mxu0 }
 0x281   :  { %v1758_v14 = vadd.f32 %v1757_v29, %v3723_v44  ;;  %v1759_v32 = vpop.f32.mrb[103].mxu0 }
 0x283   :  { %v2029_v28 = vpack.c.bf16 %v1758_v14, %v1755_v11 }
 0x285   :  { %2966 = vmatmul.mubr.bf16.gmra.mrb[132].mxu1 %v2029_v28 }
 0x286   :  { %v1762_v63 = vpop.f32.mrb[104].mxu0 }
 0x287   :  { %v1763_v23 = vadd.f32 %v1762_v63, %v3725_v49  ;;  %v1764_v33 = vpop.f32.mrb[105].mxu0  ;;  %v3786_v49 = vld [vmem:[%s3914_s3] ss:$0 sm:$0xff]  ;;  %s3532_s3 = smov [#allocation11]  }
 0x288   :  { %v1765_v35 = vpop.f32.mrb[106].mxu0  ;;  %s2611_s17 = sshll.u32 %s3532_s3, 4  ;;  %s2612_s17 = int_to_ptr.vmem [resolvable:$true] %s2611_s17 }
 0x289   :  { %v1766_v27 = vadd.f32 %v1765_v35, %v3727_v57  ;;  %v1767_v2 = vpop.f32.mrb[107].mxu0  ;;  %s3493_s18 = scalar_lea.vmem %s2612_s17, 128  ;;  %p3498_p5 = scmp.lt.s32.totalorder %s2612_s17, %s2612_s17 }
 0x28a   :  { %p3494_p4 = scmp.ne.s32.totalorder %s2612_s17, %s3493_s18  ;;  %p3499_p6 = scmp.lt.s32.totalorder %s3493_s18, %s3493_s18 }
 0x28b   :  { %v2030_v30 = vpack.c.bf16 %v1766_v27, %v1763_v23 }
 0x28c   :  { %p3500_p7 = por %p3499_p6, %p3498_p5 }
 0x28d   :  { %2969 = vmatprep.mubr.bf16.mxu1 %v2030_v30 }
 0x28e   :  { %v1770_v37 = vpop.f32.mrb[108].mxu0  ;;  %p3501_p8 = pnand %p3500_p7, %p3494_p4 }
 0x28f   :  { %v1771_v39 = vadd.f32 %v1770_v37, %v3729_v61  ;;  %v1772_v45 = vpop.f32.mrb[109].mxu0 }
 0x290   :  { %v1773_v10 = vpop.f32.mrb[110].mxu0 }
 0x291   :  { %v1774_v44 = vadd.f32 %v1773_v10, %v3731_v3  ;;  %v1775_v47 = vpop.f32.mrb[111].mxu0 }
 0x293   :  { %v2031_v34 = vpack.c.bf16 %v1774_v44, %v1771_v39 }
 0x295   :  { %2970 = vmatmul.mubr.bf16.gmra.mrb[136].mxu1 %v2031_v34 }
 0x296   :  { %v1778_v12 = vpop.f32.mrb[112].mxu0  ;;  %v2919_v57 = vpop.f32.mrb[84].mxu1 }
 0x297   :  { %v1779_v50 = vadd.f32 %v1778_v12, %v3733_v7  ;;  %v2150_v55 = vadd.f32 %v2919_v57, %v3786_v49  ;;  %v1780_v36 = vpop.f32.mrb[113].mxu0  ;;  %v2141_v61 = vpop.f32.mrb[85].mxu1 }
 0x298   :  { %v2142_v21 = vadd.f32 %v3786_v49, %v2141_v61  ;;  %v1781_v58 = vpop.f32.mrb[114].mxu0  ;;  %v2920_v3 = vpop.f32.mrb[86].mxu1 }
 0x299   :  { %v1782_v60 = vadd.f32 %v1781_v58, %v3735_v13  ;;  %v2153_v25 = vadd.f32 %v2920_v3, %v3786_v49  ;;  %v1783_v62 = vpop.f32.mrb[115].mxu0  ;;  %v2144_v40 = vpop.f32.mrb[87].mxu1  ;;  %v2398_v38 = vmax.f32 %v2150_v55, 0.0 }
 0x29a   :  { %v2145_v22 = vadd.f32 %v3786_v49, %v2144_v40  ;;  %v2396_v7 = vmax.f32 %v2142_v21, 0.0 }
 0x29b   :  { %v2032_v5 = vpack.c.bf16 %v1782_v60, %v1779_v50  ;;  %v2399_v42 = vmax.f32 %v2153_v25, 0.0 }
 0x29c   :  { %v2397_v41 = vmax.f32 %v2145_v22, 0.0 }
 0x29d   :  { %v3794_v6 = vpack.c.bf16 %v2399_v42, %v2398_v38  ;;  %2973 = vmatprep.mubr.bf16.mxu1 %v2032_v5 }
 0x29e   :  { %v3796_v8 = vpack.c.bf16 %v2397_v41, %v2396_v7  ;;  %v1786_v0 = vpop.f32.mrb[116].mxu0 }
 0x29f   :  { %v1787_v53 = vadd.f32 %v1786_v0, %v3737_v18  ;;  %v1788_v13 = vpop.f32.mrb[117].mxu0 }
 0x2a0   :  { %v1789_v46 = vpop.f32.mrb[118].mxu0 }
 0x2a1   :  { %v1790_v9 = vadd.f32 %v1789_v46, %v3739_v20  ;;  %v1791_v56 = vpop.f32.mrb[119].mxu0 }
 0x2a3   :  { %v2033_v24 = vpack.c.bf16 %v1790_v9, %v1787_v53 }
 0x2a5   :  { %2974 = vmatmul.mubr.bf16.gmra.mrb[140].mxu1 %v2033_v24 }
 0x2a6   :  { %v1794_v48 = vpop.f32.mrb[120].mxu0  ;;  %v2923_v15 = vpop.f32.mrb[88].mxu1 }
 0x2a7   :  { %v1795_v1 = vadd.f32 %v1794_v48, %v3741_v31  ;;  %v2166_v16 = vadd.f32 %v2923_v15, %v3786_v49  ;;  %v1796_v17 = vpop.f32.mrb[121].mxu0  ;;  %v2157_v4 = vpop.f32.mrb[89].mxu1 }
 0x2a8   :  { %v2158_v52 = vadd.f32 %v3786_v49, %v2157_v4  ;;  %v1797_v19 = vpop.f32.mrb[122].mxu0  ;;  %v2924_v26 = vpop.f32.mrb[90].mxu1 }
 0x2a9   :  { %v1798_v18 = vadd.f32 %v1797_v19, %v3744_v43  ;;  %v2169_v11 = vadd.f32 %v2924_v26, %v3786_v49  ;;  %v1799_v20 = vpop.f32.mrb[123].mxu0  ;;  %v2160_v54 = vpop.f32.mrb[91].mxu1  ;;  %v2402_v14 = vmax.f32 %v2166_v16, 0.0 }
 0x2aa   :  { %v2161_v29 = vadd.f32 %v3786_v49, %v2160_v54  ;;  %v2400_v31 = vmax.f32 %v2158_v52, 0.0 }
 0x2ab   :  { %v2034_v32 = vpack.c.bf16 %v1798_v18, %v1795_v1  ;;  %v2403_v28 = vmax.f32 %v2169_v11, 0.0  ;;  %v2461_v18 = vld [vmem:[#allocation9 + $0x8] sm:$0xff] }
 0x2ac   :  { %v2401_v63 = vmax.f32 %v2161_v29, 0.0 }
 0x2ad   :  { %v3806_v23 = vpack.c.bf16 %v2403_v28, %v2402_v14  ;;  %2977 = vmatprep.mubr.bf16.mxu1 %v2034_v32 }
 0x2ae   :  { %v3808_v33 = vpack.c.bf16 %v2401_v63, %v2400_v31  ;;  %v1802_v35 = vpop.f32.mrb[124].mxu0 }
 0x2af   :  { %v1803_v27 = vadd.f32 %v1802_v35, %v3747_v51  ;;  %v1804_v43 = vpop.f32.mrb[125].mxu0 }
 0x2b0   :  { %v1805_v2 = vpop.f32.mrb[126].mxu0 }
 0x2b1   :  { %v1806_v30 = vadd.f32 %v1805_v2, %v3749_v59  ;;  %v1807_v37 = vpop.f32.mrb[127].mxu0 }
 0x2b3   :  { %v2035_v39 = vpack.c.bf16 %v1806_v30, %v1803_v27 }
 0x2b5   :  { %2978 = vmatmul.mubr.bf16.gmra.mrb[144].mxu1 %v2035_v39 }
 0x2b6   :  { %v2927_v45 = vpop.f32.mrb[92].mxu1  ;;  %2528 = vmatprep.mubr.f32.mxu1 %v2461_v18 }
 0x2b7   :  { %v2182_v10 = vadd.f32 %v2927_v45, %v3786_v49  ;;  %v2173_v44 = vpop.f32.mrb[93].mxu1 }
 0x2b8   :  { %v2174_v47 = vadd.f32 %v3786_v49, %v2173_v44  ;;  %v2928_v34 = vpop.f32.mrb[94].mxu1 }
 0x2b9   :  { %v2185_v12 = vadd.f32 %v2928_v34, %v3786_v49  ;;  %v2176_v57 = vpop.f32.mrb[95].mxu1  ;;  %v2406_v51 = vmax.f32 %v2182_v10, 0.0 }
 0x2ba   :  { %v2177_v50 = vadd.f32 %v3786_v49, %v2176_v57  ;;  %v2404_v36 = vmax.f32 %v2174_v47, 0.0 }
 0x2bb   :  { %v2407_v55 = vmax.f32 %v2185_v12, 0.0 }
 0x2bc   :  { %v2405_v61 = vmax.f32 %v2177_v50, 0.0 }
 0x2bd   :  { %v3816_v59 = vpack.c.bf16 %v2407_v55, %v2406_v51 }
 0x2be   :  { %v3818_v21 = vpack.c.bf16 %v2405_v61, %v2404_v36 }
 0x2c6   :  { %v2931_v58 = vpop.f32.mrb[96].mxu1 }
 0x2c7   :  { %v2198_v3 = vadd.f32 %v2931_v58, %v3786_v49  ;;  %v2189_v60 = vpop.f32.mrb[97].mxu1 }
 0x2c8   :  { %v2190_v25 = vadd.f32 %v3786_v49, %v2189_v60  ;;  %v2932_v62 = vpop.f32.mrb[98].mxu1 }
 0x2c9   :  { %v2201_v40 = vadd.f32 %v2932_v62, %v3786_v49  ;;  %v2192_v22 = vpop.f32.mrb[99].mxu1  ;;  %v2410_v5 = vmax.f32 %v2198_v3, 0.0 }
 0x2ca   :  { %v2193_v38 = vadd.f32 %v3786_v49, %v2192_v22  ;;  %v2408_v7 = vmax.f32 %v2190_v25, 0.0 }
 0x2cb   :  { %v2411_v42 = vmax.f32 %v2201_v40, 0.0 }
 0x2cc   :  { %v2409_v41 = vmax.f32 %v2193_v38, 0.0 }
 0x2cd   :  { %v3824_v0 = vpack.c.bf16 %v2411_v42, %v2410_v5 }
 0x2ce   :  { %v3826_v53 = vpack.c.bf16 %v2409_v41, %v2408_v7  ;;  %v2463_v7 = vld [vmem:[#allocation9 + $0x18] sm:$0xff] }
 0x2d6   :  { %v2935_v13 = vpop.f32.mrb[100].mxu1 }
 0x2d7   :  { %v2214_v46 = vadd.f32 %v2935_v13, %v3786_v49  ;;  %v2205_v9 = vpop.f32.mrb[101].mxu1 }
 0x2d8   :  { %v2206_v56 = vadd.f32 %v3786_v49, %v2205_v9  ;;  %v2936_v24 = vpop.f32.mrb[102].mxu1 }
 0x2d9   :  { %v2217_v48 = vadd.f32 %v2936_v24, %v3786_v49  ;;  %v2208_v15 = vpop.f32.mrb[103].mxu1  ;;  %v2414_v16 = vmax.f32 %v2214_v46, 0.0 }
 0x2da   :  { %v2209_v1 = vadd.f32 %v3786_v49, %v2208_v15  ;;  %v2412_v4 = vmax.f32 %v2206_v56, 0.0 }
 0x2db   :  { %v2415_v17 = vmax.f32 %v2217_v48, 0.0 }
 0x2dc   :  { %v2413_v52 = vmax.f32 %v2209_v1, 0.0 }
 0x2dd   :  { %v2985_v19 = vpack.c.bf16 %v2415_v17, %v2414_v16 }
 0x2de   :  { %v2981_v26 = vpack.c.bf16 %v2413_v52, %v2412_v4 }
 0x2e0   :  { %2982 = vmatprep.subr.bf16.mxu1 %v2981_v26 }
 0x2e1   :  { %2984 = vmatpush3.bf16.msra.mxu1 %v3796_v8 }
 0x2e2   :  { %2986 = vmatprep.subr.bf16.mxu1 %v2985_v19 }
 0x2e5   :  { %2988 = vmatpush3.bf16.msra.mxu1 %v3794_v6 }
 0x2e8   :  { %v2939_v11 = vpop.f32.mrb[104].mxu1 }
 0x2e9   :  { %v2230_v20 = vadd.f32 %v2939_v11, %v3786_v49  ;;  %v2221_v54 = vpop.f32.mrb[105].mxu1 }
 0x2ea   :  { %v2222_v29 = vadd.f32 %v3786_v49, %v2221_v54  ;;  %v2940_v14 = vpop.f32.mrb[106].mxu1 }
 0x2eb   :  { %v2233_v32 = vadd.f32 %v2940_v14, %v3786_v49  ;;  %v2224_v28 = vpop.f32.mrb[107].mxu1  ;;  %v2418_v63 = vmax.f32 %v2230_v20, 0.0 }
 0x2ec   :  { %v2225_v31 = vadd.f32 %v3786_v49, %v2224_v28  ;;  %v2416_v27 = vmax.f32 %v2222_v29, 0.0 }
 0x2ed   :  { %v2419_v35 = vmax.f32 %v2233_v32, 0.0 }
 0x2ee   :  { %v2417_v8 = vmax.f32 %v2225_v31, 0.0 }
 0x2ef   :  { %v2993_v43 = vpack.c.bf16 %v2419_v35, %v2418_v63 }
 0x2f0   :  { %v2989_v2 = vpack.c.bf16 %v2417_v8, %v2416_v27 }
 0x2f2   :  { %2990 = vmatprep.subr.bf16.mxu1 %v2989_v2 }
 0x2f3   :  { %2992 = vmatpush3.bf16.msra.mxu1 %v3808_v33 }
 0x2f4   :  { %2994 = vmatprep.subr.bf16.mxu1 %v2993_v43 }
 0x2f7   :  { %2996 = vmatpush3.bf16.msra.mxu1 %v3806_v23 }
 0x2f8   :  { %v2943_v6 = vpop.f32.mrb[108].mxu1 }
 0x2f9   :  { %v2246_v30 = vadd.f32 %v2943_v6, %v3786_v49  ;;  %v2237_v37 = vpop.f32.mrb[109].mxu1 }
 0x2fa   :  { %v2238_v39 = vadd.f32 %v3786_v49, %v2237_v37  ;;  %v2944_v45 = vpop.f32.mrb[110].mxu1 }
 0x2fb   :  { %v2249_v10 = vadd.f32 %v2944_v45, %v3786_v49  ;;  %v2240_v44 = vpop.f32.mrb[111].mxu1  ;;  %v2422_v34 = vmax.f32 %v2246_v30, 0.0 }
 0x2fc   :  { %v2241_v47 = vadd.f32 %v3786_v49, %v2240_v44  ;;  %v2420_v57 = vmax.f32 %v2238_v39, 0.0 }
 0x2fd   :  { %v2423_v12 = vmax.f32 %v2249_v10, 0.0 }
 0x2fe   :  { %v2421_v50 = vmax.f32 %v2241_v47, 0.0 }
 0x2ff   :  { %v3001_v33 = vpack.c.bf16 %v2423_v12, %v2422_v34 }
 0x300   :  { %v2997_v51 = vpack.c.bf16 %v2421_v50, %v2420_v57 }
 0x302   :  { %2998 = vmatprep.subr.bf16.mxu1 %v2997_v51 }
 0x303   :  { %3000 = vmatpush3.bf16.msra.mxu1 %v3818_v21 }
 0x304   :  { %3002 = vmatprep.subr.bf16.mxu1 %v3001_v33 }
 0x307   :  { %3004 = vmatpush3.bf16.msra.mxu1 %v3816_v59  ;;  %v2460_v59 = vld [vmem:[#allocation9] sm:$0xff] }
 0x308   :  { %v2947_v23 = vpop.f32.mrb[112].mxu1 }
 0x309   :  { %v2262_v55 = vadd.f32 %v2947_v23, %v3786_v49  ;;  %v2253_v36 = vpop.f32.mrb[113].mxu1 }
 0x30a   :  { %v2254_v61 = vadd.f32 %v3786_v49, %v2253_v36  ;;  %v2948_v58 = vpop.f32.mrb[114].mxu1 }
 0x30b   :  { %v2265_v3 = vadd.f32 %v2948_v58, %v3786_v49  ;;  %v2256_v60 = vpop.f32.mrb[115].mxu1  ;;  %v2426_v62 = vmax.f32 %v2262_v55, 0.0 }
 0x30c   :  { %v2257_v25 = vadd.f32 %v3786_v49, %v2256_v60  ;;  %v2424_v22 = vmax.f32 %v2254_v61, 0.0 }
 0x30d   :  { %v2427_v40 = vmax.f32 %v2265_v3, 0.0 }
 0x30e   :  { %v2425_v38 = vmax.f32 %v2257_v25, 0.0 }
 0x30f   :  { %v3009_v21 = vpack.c.bf16 %v2427_v40, %v2426_v62 }
 0x310   :  { %v3005_v5 = vpack.c.bf16 %v2425_v38, %v2424_v22 }
 0x312   :  { %3006 = vmatprep.subr.bf16.mxu1 %v3005_v5 }
 0x313   :  { %3008 = vmatpush3.bf16.msra.mxu1 %v3826_v53 }
 0x314   :  { %3010 = vmatprep.subr.bf16.mxu1 %v3009_v21 }
 0x317   :  { %3012 = vmatpush3.bf16.msra.mxu1 %v3824_v0 }
 0x318   :  { %v2951_v42 = vpop.f32.mrb[116].mxu1 }
 0x319   :  { %v2278_v41 = vadd.f32 %v2951_v42, %v3786_v49  ;;  %v2269_v13 = vpop.f32.mrb[117].mxu1 }
 0x31a   :  { %v2270_v46 = vadd.f32 %v3786_v49, %v2269_v13  ;;  %v2952_v9 = vpop.f32.mrb[118].mxu1  ;;  %2529 = vmatmul.mubr.f32.vlgmr.msra.gmra.mrb[148].mxu1 %v2460_v59 }
 0x31b   :  { %v2281_v56 = vadd.f32 %v2952_v9, %v3786_v49  ;;  %v2272_v24 = vpop.f32.mrb[119].mxu1  ;;  %2598 = vmatprep.mubr.f32.mxu1 %v2463_v7  ;;  %v2430_v53 = vmax.f32 %v2278_v41, 0.0 }
 0x31c   :  { %v2273_v48 = vadd.f32 %v3786_v49, %v2272_v24  ;;  %v2428_v1 = vmax.f32 %v2270_v46, 0.0 }
 0x31d   :  { %v2431_v15 = vmax.f32 %v2281_v56, 0.0 }
 0x31e   :  { %v2429_v0 = vmax.f32 %v2273_v48, 0.0 }
 0x31f   :  { %v3019_v16 = vpack.c.bf16 %v2431_v15, %v2430_v53 }
 0x320   :  { %v3015_v17 = vpack.c.bf16 %v2429_v0, %v2428_v1 }
 0x328   :  { %v2955_v4 = vpop.f32.mrb[120].mxu1 }
 0x329   :  { %v2294_v52 = vadd.f32 %v2955_v4, %v3786_v49  ;;  %v2285_v19 = vpop.f32.mrb[121].mxu1 }
 0x32a   :  { %v2286_v26 = vadd.f32 %v3786_v49, %v2285_v19  ;;  %v2956_v18 = vpop.f32.mrb[122].mxu1 }
 0x32b   :  { %v2297_v11 = vadd.f32 %v2956_v18, %v3786_v49  ;;  %v2288_v20 = vpop.f32.mrb[123].mxu1  ;;  %v2434_v29 = vmax.f32 %v2294_v52, 0.0 }
 0x32c   :  { %v2289_v54 = vadd.f32 %v3786_v49, %v2288_v20  ;;  %v2432_v32 = vmax.f32 %v2286_v26, 0.0 }
 0x32d   :  { %v2435_v14 = vmax.f32 %v2297_v11, 0.0 }
 0x32e   :  { %v2433_v28 = vmax.f32 %v2289_v54, 0.0 }
 0x32f   :  { %v3860_v31 = vpack.c.bf16 %v2435_v14, %v2434_v29 }
 0x330   :  { %v3023_v63 = vpack.c.bf16 %v2433_v28, %v2432_v32 }
 0x338   :  { %v2959_v35 = vpop.f32.mrb[124].mxu1 }
 0x339   :  { %v2310_v27 = vadd.f32 %v2959_v35, %v3786_v49  ;;  %v2301_v8 = vpop.f32.mrb[125].mxu1 }
 0x33a   :  { %v2302_v43 = vadd.f32 %v3786_v49, %v2301_v8  ;;  %v2960_v2 = vpop.f32.mrb[126].mxu1 }
 0x33b   :  { %v2313_v6 = vadd.f32 %v2960_v2, %v3786_v49  ;;  %v2304_v30 = vpop.f32.mrb[127].mxu1  ;;  %v2438_v39 = vmax.f32 %v2310_v27, 0.0 }
 0x33c   :  { %v2305_v37 = vadd.f32 %v3786_v49, %v2304_v30  ;;  %v2436_v10 = vmax.f32 %v2302_v43, 0.0 }
 0x33d   :  { %v2439_v45 = vmax.f32 %v2313_v6, 0.0 }
 0x33e   :  { %v2437_v44 = vmax.f32 %v2305_v37, 0.0 }
 0x33f   :  { %v3866_v47 = vpack.c.bf16 %v2439_v45, %v2438_v39 }
 0x340   :  { %v3868_v34 = vpack.c.bf16 %v2437_v44, %v2436_v10 }
 0x348   :  { %v2963_v12 = vpop.f32.mrb[128].mxu1 }
 0x349   :  { %v2326_v57 = vadd.f32 %v2963_v12, %v3786_v49  ;;  %v2317_v50 = vpop.f32.mrb[129].mxu1 }
 0x34a   :  { %v2318_v33 = vadd.f32 %v3786_v49, %v2317_v50  ;;  %v2964_v51 = vpop.f32.mrb[130].mxu1 }
 0x34b   :  { %v2329_v23 = vadd.f32 %v2964_v51, %v3786_v49  ;;  %v2320_v55 = vpop.f32.mrb[131].mxu1  ;;  %v2442_v61 = vmax.f32 %v2326_v57, 0.0 }
 0x34c   :  { %v2321_v36 = vadd.f32 %v3786_v49, %v2320_v55  ;;  %v2440_v3 = vmax.f32 %v2318_v33, 0.0 }
 0x34d   :  { %v2443_v58 = vmax.f32 %v2329_v23, 0.0 }
 0x34e   :  { %v2441_v60 = vmax.f32 %v2321_v36, 0.0 }
 0x34f   :  { %v3874_v25 = vpack.c.bf16 %v2443_v58, %v2442_v61 }
 0x350   :  { %v3876_v62 = vpack.c.bf16 %v2441_v60, %v2440_v3 }
 0x358   :  { %v2967_v40 = vpop.f32.mrb[132].mxu1 }
 0x359   :  { %v2342_v22 = vadd.f32 %v2967_v40, %v3786_v49  ;;  %v2333_v38 = vpop.f32.mrb[133].mxu1 }
 0x35a   :  { %v2334_v21 = vadd.f32 %v3786_v49, %v2333_v38  ;;  %v2968_v5 = vpop.f32.mrb[134].mxu1 }
 0x35b   :  { %v2345_v59 = vadd.f32 %v2968_v5, %v3786_v49  ;;  %v2336_v42 = vpop.f32.mrb[135].mxu1  ;;  %v2446_v41 = vmax.f32 %v2342_v22, 0.0 }
 0x35c   :  { %v2337_v7 = vadd.f32 %v3786_v49, %v2336_v42  ;;  %v2444_v46 = vmax.f32 %v2334_v21, 0.0 }
 0x35d   :  { %v2447_v13 = vmax.f32 %v2345_v59, 0.0 }
 0x35e   :  { %v2445_v9 = vmax.f32 %v2337_v7, 0.0 }
 0x35f   :  { %v3017_v56 = vpack.c.bf16 %v2447_v13, %v2446_v41 }
 0x360   :  { %v3013_v24 = vpack.c.bf16 %v2445_v9, %v2444_v46 }
 0x362   :  { %3014 = vmatprep.subr.bf16.mxu1 %v3013_v24 }
 0x363   :  { %3016 = vmatpush3.bf16.msra.mxu1 %v3015_v17 }
 0x364   :  { %3018 = vmatprep.subr.bf16.mxu1 %v3017_v56 }
 0x367   :  { %3020 = vmatpush3.bf16.msra.mxu1 %v3019_v16 }
 0x368   :  { %v2971_v48 = vpop.f32.mrb[136].mxu1 }
 0x369   :  { %v2358_v53 = vadd.f32 %v2971_v48, %v3786_v49  ;;  %v2349_v15 = vpop.f32.mrb[137].mxu1 }
 0x36a   :  { %v2350_v1 = vadd.f32 %v3786_v49, %v2349_v15  ;;  %v2972_v0 = vpop.f32.mrb[138].mxu1 }
 0x36b   :  { %v2361_v4 = vadd.f32 %v2972_v0, %v3786_v49  ;;  %v2352_v52 = vpop.f32.mrb[139].mxu1  ;;  %v2450_v26 = vmax.f32 %v2358_v53, 0.0 }
 0x36c   :  { %v2353_v19 = vadd.f32 %v3786_v49, %v2352_v52  ;;  %v2448_v11 = vmax.f32 %v2350_v1, 0.0 }
 0x36d   :  { %v2451_v18 = vmax.f32 %v2361_v4, 0.0 }
 0x36e   :  { %v2449_v20 = vmax.f32 %v2353_v19, 0.0 }
 0x36f   :  { %v3025_v54 = vpack.c.bf16 %v2451_v18, %v2450_v26 }
 0x370   :  { %v3021_v17 = vpack.c.bf16 %v2449_v20, %v2448_v11 }
 0x372   :  { %3022 = vmatprep.subr.bf16.mxu1 %v3021_v17 }
 0x373   :  { %3024 = vmatpush3.bf16.msra.mxu1 %v3023_v63 }
 0x374   :  { %3026 = vmatprep.subr.bf16.mxu1 %v3025_v54 }
 0x377   :  { %3028 = vmatpush3.bf16.msra.mxu1 %v3860_v31 }
 0x378   :  { %v2975_v16 = vpop.f32.mrb[140].mxu1 }
 0x379   :  { %v2374_v29 = vadd.f32 %v2975_v16, %v3786_v49  ;;  %v2365_v14 = vpop.f32.mrb[141].mxu1 }
 0x37a   :  { %v2366_v32 = vadd.f32 %v3786_v49, %v2365_v14  ;;  %v2976_v28 = vpop.f32.mrb[142].mxu1 }
 0x37b   :  { %v2377_v35 = vadd.f32 %v2976_v28, %v3786_v49  ;;  %v2368_v27 = vpop.f32.mrb[143].mxu1  ;;  %v2454_v43 = vmax.f32 %v2374_v29, 0.0 }
 0x37c   :  { %v2369_v8 = vadd.f32 %v3786_v49, %v2368_v27  ;;  %v2452_v6 = vmax.f32 %v2366_v32, 0.0 }
 0x37d   :  { %v2455_v2 = vmax.f32 %v2377_v35, 0.0 }
 0x37e   :  { %v2453_v30 = vmax.f32 %v2369_v8, 0.0 }
 0x37f   :  { %v3033_v63 = vpack.c.bf16 %v2455_v2, %v2454_v43 }
 0x380   :  { %v3029_v37 = vpack.c.bf16 %v2453_v30, %v2452_v6 }
 0x382   :  { %3030 = vmatprep.subr.bf16.mxu1 %v3029_v37 }
 0x383   :  { %3032 = vmatpush3.bf16.msra.mxu1 %v3868_v34 }
 0x384   :  { %3034 = vmatprep.subr.bf16.mxu1 %v3033_v63 }
 0x387   :  { %3036 = vmatpush3.bf16.msra.mxu1 %v3866_v47  ;;  %v2462_v47 = vld [vmem:[#allocation9 + $0x10] sm:$0xff] }
 0x388   :  { %v2979_v31 = vpop.f32.mrb[144].mxu1 }
 0x389   :  { %v2390_v39 = vadd.f32 %v2979_v31, %v3786_v49  ;;  %v2381_v45 = vpop.f32.mrb[145].mxu1 }
 0x38a   :  { %v2382_v10 = vadd.f32 %v3786_v49, %v2381_v45  ;;  %v2980_v44 = vpop.f32.mrb[146].mxu1 }
 0x38b   :  { %v2393_v12 = vadd.f32 %v2980_v44, %v3786_v49  ;;  %v2384_v57 = vpop.f32.mrb[147].mxu1  ;;  %v2458_v33 = vmax.f32 %v2390_v39, 0.0 }
 0x38c   :  { %v2385_v50 = vadd.f32 %v3786_v49, %v2384_v57  ;;  %v2456_v23 = vmax.f32 %v2382_v10, 0.0 }
 0x38d   :  { %v2459_v51 = vmax.f32 %v2393_v12, 0.0 }
 0x38e   :  { %v2457_v55 = vmax.f32 %v2385_v50, 0.0 }
 0x38f   :  { %v3041_v34 = vpack.c.bf16 %v2459_v51, %v2458_v33 }
 0x390   :  { %v3037_v36 = vpack.c.bf16 %v2457_v55, %v2456_v23 }
 0x392   :  { %3038 = vmatprep.subr.bf16.mxu1 %v3037_v36 }
 0x393   :  { %3040 = vmatpush3.bf16.msra.mxu1 %v3876_v62 }
 0x394   :  { %3042 = vmatprep.subr.bf16.mxu1 %v3041_v34 }
 0x397   :  { %3044 = vmatpush3.bf16.msra.mxu1 %v3874_v25 }
 0x39a   :  { %2599 = vmatmul.mubr.f32.vlgmr.msra.gmra.mrb[150].mxu1 %v2462_v47 }
 0x3ed   :  { %v2863_v61 = vpop.f32.mrb[148].mxu1 }
 0x3ee   :  { %v2864_v58 = vpop.f32.mrb[149].mxu1 }
 0x3ef   :  { %v2865_v3 = vadd.f32 %v2864_v58, %v2863_v61 }
 0x46d   :  { %v2898_v60 = vpop.f32.mrb[150].mxu1 }
 0x46e   :  { %v2899_v40 = vpop.f32.mrb[151].mxu1 }
 0x46f   :  { %v2900_v49 = vadd.f32 %v2899_v40, %v2898_v60 }
 0x471   :  { %v2601_v22 = vadd.f32 %v2900_v49, %v2865_v3 }
 0x473   :  { %2604 = vst [vmem:[#allocation11] sm:$0xff] %v2601_v22 }
 0x474   :  { %3504 = shalt.err (!%p3501_p8)
}
 0x475   :  { %s3505_s21 = scalar_lea.hbm %s3916_s5, 128 }
 0x476   :  { %p3506_p9 = scmp.ne.s32.totalorder %s3916_s5, %s3505_s21  ;;  %p3509_p10 = scmp.lt.u32.totalorder %s3505_s21, %s3916_s5 }
 0x478   :  { %p3511_p11 = pnand %p3509_p10, %p3506_p9 }
 0x47a   :  { %3514 = shalt.err (!%p3511_p11)
}
 0x47b   :  { %2614 = dma.vmem_to_hbm [thread:$0]  %s2612_s17, 128, %s3916_s5, [#allocation5]  }
 0x47c   :  { %3521 = dma.done.wait [#allocation5], 128  }
 0x47d   :  { %3522 = vsyncadd [#allocation5], 4294967168 }
 0x47e   :  { %2618 = vsyncpa [#allocation4], 1 }
 0x47f   :  { %2619 = vsyncpa [#allocation7], 1 }
 0x480   :  { %2620 = vsyncpa [#allocation10], 1 }
 0x481   :  { %2621 = vsyncpa [#allocation5], 1 }

</bundles_post_ra>
